<compile_context>
chip_gen: v7x
topology: tpu7x:2x2x1
jax: 0.10.0
libtpu: 0.0.40
codegen_flags: <defaults>
</compile_context>

<pallas_src>
import math
import jax
import jax.numpy as jnp
from jax.experimental import pallas as pl
from jax.experimental.pallas import tpu as pltpu

# -------- scaled-down BERT config --------
B = 2            # batch
S = 8            # sequence length
H = 128          # bert hidden size (== pooler output dim == lin1 input_dim)
NUM_HEADS = 4
HEAD_DIM = H // NUM_HEADS
FFN = 256        # intermediate size
NUM_LAYERS = 2
VOCAB = 64
TYPE_VOCAB = 2
HIDDEN_SIZE = 64  # lin1 output size (args.hidden_size)
NUM_CLASS = 6     # args.num_class
LN_EPS = 1e-12


# =======================================================================
# Fused Pallas kernel: all encoder layers (grid axis) + pooler + head
# =======================================================================
def fused_bert_kernel(x_ref, maskb_ref,
                      wqkv_ref, bqkv_ref, wo_ref, bo_ref, ln1g_ref, ln1b_ref,
                      wi_ref, bi_ref, wo2_ref, bo2_ref, ln2g_ref, ln2b_ref,
                      wp_ref, bp_ref, w1_ref, b1_ref, w2_ref, b2_ref,
                      yhat_ref, x_scr):
    l = pl.program_id(0)

    @pl.when(l == 0)
    def _():
        # bring the embedding output into the resident VMEM carry
        x_scr[...] = x_ref[...].reshape(B * S, H).astype(jnp.float32)

    xf = x_scr[...]                                   # [B*S, H] f32 carry
    mb = maskb_ref[...]                               # [NH*B, 1, S] additive bias

    # ---- self-attention -------------------------------------------------
    # fused QKV projection: bf16 operands, f32 accumulation
    qkv = jnp.dot(xf.astype(jnp.bfloat16), wqkv_ref[...],
                  preferred_element_type=jnp.float32) + bqkv_ref[...]   # [B*S, 3H]
    q = qkv[:, 0:H].reshape(B, S, H)
    k = qkv[:, H:2 * H].reshape(B, S, H)
    v = qkv[:, 2 * H:3 * H].reshape(B, S, H)

    # Heads folded onto the MAJOR (batch) axis -> one contraction pair and one
    # softmax for ALL heads.  (A [B,S,NH,HD] reshape + (0,2,1,3) transpose or a
    # 2-batch-dim dot_general does not lower in Mosaic, so the head axis is
    # moved with major-axis concats of static lane slices instead.)
    def split_heads(t):                               # [B,S,H] f32 -> [NH*B,S,HD] bf16
        return jnp.concatenate(
            [t[:, :, h * HEAD_DIM:(h + 1) * HEAD_DIM] for h in range(NUM_HEADS)],
            axis=0).astype(jnp.bfloat16)

    qh, kh, vh = split_heads(q), split_heads(k), split_heads(v)

    scale = 1.0 / math.sqrt(HEAD_DIM)
    scores = jnp.einsum('bqd,bkd->bqk', qh, kh,
                        preferred_element_type=jnp.float32) * scale      # [NH*B,S,S]
    scores = scores + mb                              # mask key positions
    m = jnp.max(scores, axis=-1, keepdims=True)
    p = jnp.exp(scores - m)
    inv = pl.reciprocal(jnp.sum(p, axis=-1, keepdims=True), approx=True)
    p = (p * inv).astype(jnp.bfloat16)
    ctx_h = jnp.einsum('bqk,bkd->bqd', p, vh,
                       preferred_element_type=jnp.float32)               # [NH*B,S,HD]
    # back to [B*S, H]: per-head blocks are contiguous along the major axis
    ctx = jnp.concatenate(
        [ctx_h[hh * B:(hh + 1) * B] for hh in range(NUM_HEADS)],
        axis=-1).reshape(B * S, H)
    # single full-lane-width output projection over all heads
    attn = jnp.dot(ctx.astype(jnp.bfloat16), wo_ref[...],
                   preferred_element_type=jnp.float32) + bo_ref[...]

    def layernorm(val, g, b):                         # f32 math (no bf16 VPU on v5e)
        mu = jnp.mean(val, axis=-1, keepdims=True)
        var = jnp.mean((val - mu) ** 2, axis=-1, keepdims=True)
        return (val - mu) * jax.lax.rsqrt(var + LN_EPS) * g + b

    h1 = layernorm(xf + attn, ln1g_ref[...], ln1b_ref[...])   # [B*S, H]

    # ---- feed-forward ----------------------------------------------------
    inter = jnp.dot(h1.astype(jnp.bfloat16), wi_ref[...],
                    preferred_element_type=jnp.float32) + bi_ref[...]    # [B*S, FFN]
    # TODO(synk): bert-base uses the exact (erf) GELU; tanh approximation here.
    inter = 0.5 * inter * (1.0 + jnp.tanh(
        0.7978845608028654 * (inter + 0.044715 * inter * inter * inter)))
    ffn = jnp.dot(inter.astype(jnp.bfloat16), wo2_ref[...],
                  preferred_element_type=jnp.float32) + bo2_ref[...]     # [B*S, H]
    out = layernorm(h1 + ffn, ln2g_ref[...], ln2b_ref[...])
    x_scr[...] = out                                  # carry to next layer

    # ---- pooler + lin1/ReLU/(dropout) + lin2 + log_softmax + argmax ------
    @pl.when(l == NUM_LAYERS - 1)
    def _():
        cls = out.reshape(B, S, H)[:, 0, :]           # [B, H] ([CLS] token)
        pooled = jnp.tanh(jnp.dot(cls.astype(jnp.bfloat16), wp_ref[...],
                                  preferred_element_type=jnp.float32) + bp_ref[...])
        hid = jnp.maximum(jnp.dot(pooled.astype(jnp.bfloat16), w1_ref[...],
                                  preferred_element_type=jnp.float32) + b1_ref[...],
                          0.0)
        # dropout: identity (inference / eval mode)
        scores2 = jnp.dot(hid.astype(jnp.bfloat16), w2_ref[...],
                          preferred_element_type=jnp.float32) + b2_ref[...]  # [B, C]
        m2 = jnp.max(scores2, axis=-1, keepdims=True)
        lse = jnp.log(jnp.sum(jnp.exp(scores2 - m2), axis=-1, keepdims=True)) + m2
        log_prob = scores2 - lse                      # log_softmax
        col = jax.lax.broadcasted_iota(jnp.int32, log_prob.shape, 1)
        maxv = jnp.max(log_prob, axis=-1, keepdims=True)
        yhat = jnp.min(jnp.where(log_prob == maxv, col, NUM_CLASS), axis=-1)
        yhat_ref[...] = yhat[:, None].astype(jnp.int32)


# =======================================================================
# Wrapper: one pallas_call, grid over encoder layers
# =======================================================================
def fused_bert_pallas(params, x, mask_bias_h):
    full2 = lambda l: (0, 0)           # head weights / output: same block every step
    full3 = lambda l: (0, 0, 0)        # x / mask: same block every step
    per_layer = lambda l: (l, 0, 0)    # stacked per-layer weights
    sq = pl.Squeezed()                 # layer dim squeezed out of kernel refs

    in_specs = [
        pl.BlockSpec((B, S, H), full3),                    # x (embedding output)
        pl.BlockSpec((NUM_HEADS * B, 1, S), full3),        # mask bias, head-major
        pl.BlockSpec((sq, H, 3 * H), per_layer),           # wqkv
        pl.BlockSpec((sq, 1, 3 * H), per_layer),           # bqkv
        pl.BlockSpec((sq, H, H), per_layer),               # wo
        pl.BlockSpec((sq, 1, H), per_layer),               # bo
        pl.BlockSpec((sq, 1, H), per_layer),               # ln1_g
        pl.BlockSpec((sq, 1, H), per_layer),               # ln1_b
        pl.BlockSpec((sq, H, FFN), per_layer),             # wi
        pl.BlockSpec((sq, 1, FFN), per_layer),             # bi
        pl.BlockSpec((sq, FFN, H), per_layer),             # wo2
        pl.BlockSpec((sq, 1, H), per_layer),               # bo2
        pl.BlockSpec((sq, 1, H), per_layer),               # ln2_g
        pl.BlockSpec((sq, 1, H), per_layer),               # ln2_b
        pl.BlockSpec((H, H), full2),                       # pooler_w
        pl.BlockSpec((1, H), full2),                       # pooler_b
        pl.BlockSpec((H, HIDDEN_SIZE), full2),             # lin1_w
        pl.BlockSpec((1, HIDDEN_SIZE), full2),             # lin1_b
        pl.BlockSpec((HIDDEN_SIZE, NUM_CLASS), full2),     # lin2_w
        pl.BlockSpec((1, NUM_CLASS), full2),               # lin2_b
    ]

    yhat = pl.pallas_call(
        fused_bert_kernel,
        out_shape=jax.ShapeDtypeStruct((B, 1), jnp.int32),
        grid_spec=pltpu.PrefetchScalarGridSpec(
            num_scalar_prefetch=0,
            grid=(NUM_LAYERS,),
            in_specs=in_specs,
            out_specs=pl.BlockSpec((B, 1), full2),
            scratch_shapes=[pltpu.VMEM((B * S, H), jnp.float32)]),
        # layer axis carries a dependency (x lives in scratch) -> "arbitrary".
        # TODO(synk): at realistic B/S add a leading "parallel" row-tile axis
        # (v7x second TensorCore) and tile wi/wo2 over FFN or raise
        # vmem_limit_bytes for bert-base scale weights.
        compiler_params=pltpu.CompilerParams(
            dimension_semantics=("arbitrary",)),
    )(x, mask_bias_h,
      params['wqkv'], params['bqkv'], params['wo'], params['bo'],
      params['ln1_g'], params['ln1_b'],
      params['wi'], params['bi'], params['wo2'], params['bo2'],
      params['ln2_g'], params['ln2_b'],
      params['pooler_w'], params['pooler_b'],
      params['lin1_w'], params['lin1_b'],
      params['lin2_w'], params['lin2_b'])
    return yhat[:, 0]


# =======================================================================
# Parameters (synthetic, deterministic) and the full forward pass
# =======================================================================
def init_params(key):
    keys = iter(jax.random.split(key, 40))

    def nrm(shape, dtype=jnp.float32):
        return (0.02 * jax.random.normal(next(keys), shape, jnp.float32)).astype(dtype)

    return {
        # embeddings (JAX glue)
        'word_emb': nrm((VOCAB, H)),
        'pos_emb': nrm((S, H)),
        'type_emb': nrm((TYPE_VOCAB, H)),
        'emb_ln_g': jnp.ones((H,), jnp.float32),
        'emb_ln_b': jnp.zeros((H,), jnp.float32),
        # stacked encoder-layer weights (bf16 matmul operands, f32 bias/LN)
        'wqkv': nrm((NUM_LAYERS, H, 3 * H), jnp.bfloat16),
        'bqkv': jnp.zeros((NUM_LAYERS, 1, 3 * H), jnp.float32),
        'wo': nrm((NUM_LAYERS, H, H), jnp.bfloat16),
        'bo': jnp.zeros((NUM_LAYERS, 1, H), jnp.float32),
        'ln1_g': jnp.ones((NUM_LAYERS, 1, H), jnp.float32),
        'ln1_b': jnp.zeros((NUM_LAYERS, 1, H), jnp.float32),
        'wi': nrm((NUM_LAYERS, H, FFN), jnp.bfloat16),
        'bi': jnp.zeros((NUM_LAYERS, 1, FFN), jnp.float32),
        'wo2': nrm((NUM_LAYERS, FFN, H), jnp.bfloat16),
        'bo2': jnp.zeros((NUM_LAYERS, 1, H), jnp.float32),
        'ln2_g': jnp.ones((NUM_LAYERS, 1, H), jnp.float32),
        'ln2_b': jnp.zeros((NUM_LAYERS, 1, H), jnp.float32),
        # pooler + classification head
        'pooler_w': nrm((H, H), jnp.bfloat16),
        'pooler_b': jnp.zeros((1, H), jnp.float32),
        'lin1_w': nrm((H, HIDDEN_SIZE), jnp.bfloat16),
        'lin1_b': jnp.zeros((1, HIDDEN_SIZE), jnp.float32),
        'lin2_w': nrm((HIDDEN_SIZE, NUM_CLASS), jnp.bfloat16),
        'lin2_b': jnp.zeros((1, NUM_CLASS), jnp.float32),
    }


def bert_baseline_forward(params, input_ids, attention_mask, token_type_ids):
    # --- embeddings (glue: gathers + LayerNorm in plain JAX) ---
    # TODO(synk): could be folded into the kernel with scalar-prefetched ids +
    # pl.Element row-gather BlockSpecs to remove one launch and an HBM round trip.
    pos = jnp.arange(S)
    emb = (jnp.take(params['word_emb'], input_ids, axis=0)
           + params['pos_emb'][pos][None, :, :]
           + jnp.take(params['type_emb'], token_type_ids, axis=0))
    mu = jnp.mean(emb, axis=-1, keepdims=True)
    var = jnp.mean((emb - mu) ** 2, axis=-1, keepdims=True)
    x = ((emb - mu) * jax.lax.rsqrt(var + LN_EPS) * params['emb_ln_g']
         + params['emb_ln_b']).astype(jnp.float32)

    # additive attention-mask bias, BERT-style: (1 - mask) * -10000,
    # replicated head-major once here: [NUM_HEADS*B, 1, S]
    mask_bias = (1.0 - attention_mask.astype(jnp.float32)) * -10000.0
    mask_bias_h = jnp.tile(mask_bias, (NUM_HEADS, 1))[:, None, :]

    # --- fused Pallas kernel: all encoder layers + pooler + classifier ---
    y_hat = fused_bert_pallas(params, x, mask_bias_h)   # == torch.argmax output
    return y_hat


if __name__ == "__main__":
    key = jax.random.PRNGKey(0)
    k_param, k_ids, k_type = jax.random.split(key, 3)

    params = init_params(k_param)

    input_ids = jax.random.randint(k_ids, (B, S), 0, VOCAB, dtype=jnp.int32)
    token_type_ids = jax.random.randint(k_type, (B, S), 0, TYPE_VOCAB, dtype=jnp.int32)
    attention_mask = jnp.ones((B, S), jnp.int32).at[1, S - 2:].set(0)  # pad tail of batch 1

    y_hat = bert_baseline_forward(params, input_ids, attention_mask, token_type_ids)
    y_hat = jax.block_until_ready(y_hat)
    assert y_hat.shape == (B,) and y_hat.dtype == jnp.int32
    print("KERNEL_OK")
</pallas_src>

<mosaic_0001>
module attributes {stable_mosaic.version = 11 : i64} {
  func.func @fused_bert_kernel(%arg0: i32, %arg1: memref<2x8x128xf32, #tpu.memory_space<vmem>>, %arg2: memref<8x1x8xf32, #tpu.memory_space<vmem>>, %arg3: memref<1x128x384xbf16, #tpu.memory_space<vmem>>, %arg4: memref<1x1x384xf32, #tpu.memory_space<vmem>>, %arg5: memref<1x128x128xbf16, #tpu.memory_space<vmem>>, %arg6: memref<1x1x128xf32, #tpu.memory_space<vmem>>, %arg7: memref<1x1x128xf32, #tpu.memory_space<vmem>>, %arg8: memref<1x1x128xf32, #tpu.memory_space<vmem>>, %arg9: memref<1x128x256xbf16, #tpu.memory_space<vmem>>, %arg10: memref<1x1x256xf32, #tpu.memory_space<vmem>>, %arg11: memref<1x256x128xbf16, #tpu.memory_space<vmem>>, %arg12: memref<1x1x128xf32, #tpu.memory_space<vmem>>, %arg13: memref<1x1x128xf32, #tpu.memory_space<vmem>>, %arg14: memref<1x1x128xf32, #tpu.memory_space<vmem>>, %arg15: memref<128x128xbf16, #tpu.memory_space<vmem>>, %arg16: memref<1x128xf32, #tpu.memory_space<vmem>>, %arg17: memref<128x64xbf16, #tpu.memory_space<vmem>>, %arg18: memref<1x64xf32, #tpu.memory_space<vmem>>, %arg19: memref<64x6xbf16, #tpu.memory_space<vmem>>, %arg20: memref<1x6xf32, #tpu.memory_space<vmem>>, %arg21: memref<2x1xi32, #tpu.memory_space<vmem>>, %arg22: memref<16x128xf32, #tpu.memory_space<vmem>>) attributes {dimension_semantics = [#tpu.dimension_semantics<arbitrary>], iteration_bounds = array<i64: 2>, scalar_prefetch = 0 : i64, scratch_operands = 1 : i64, tpu.core_type = #tpu.core_type<tc>, window_params = [{pipeline_mode = #tpu.pipeline_mode<synchronous>, transform_indices = @transform_0, window_bounds = array<i64: 2, 8, 128>}, {pipeline_mode = #tpu.pipeline_mode<synchronous>, transform_indices = @transform_1, window_bounds = array<i64: 8, 1, 8>}, {transform_indices = @transform_2, window_bounds = array<i64: 1, 128, 384>}, {transform_indices = @transform_3, window_bounds = array<i64: 1, 1, 384>}, {transform_indices = @transform_4, window_bounds = array<i64: 1, 128, 128>}, {transform_indices = @transform_5, window_bounds = array<i64: 1, 1, 128>}, {transform_indices = @transform_6, window_bounds = array<i64: 1, 1, 128>}, {transform_indices = @transform_7, window_bounds = array<i64: 1, 1, 128>}, {transform_indices = @transform_8, window_bounds = array<i64: 1, 128, 256>}, {transform_indices = @transform_9, window_bounds = array<i64: 1, 1, 256>}, {transform_indices = @transform_10, window_bounds = array<i64: 1, 256, 128>}, {transform_indices = @transform_11, window_bounds = array<i64: 1, 1, 128>}, {transform_indices = @transform_12, window_bounds = array<i64: 1, 1, 128>}, {transform_indices = @transform_13, window_bounds = array<i64: 1, 1, 128>}, {pipeline_mode = #tpu.pipeline_mode<synchronous>, transform_indices = @transform_14, window_bounds = array<i64: 128, 128>}, {pipeline_mode = #tpu.pipeline_mode<synchronous>, transform_indices = @transform_15, window_bounds = array<i64: 1, 128>}, {pipeline_mode = #tpu.pipeline_mode<synchronous>, transform_indices = @transform_16, window_bounds = array<i64: 128, 64>}, {pipeline_mode = #tpu.pipeline_mode<synchronous>, transform_indices = @transform_17, window_bounds = array<i64: 1, 64>}, {pipeline_mode = #tpu.pipeline_mode<synchronous>, transform_indices = @transform_18, window_bounds = array<i64: 64, 6>}, {pipeline_mode = #tpu.pipeline_mode<synchronous>, transform_indices = @transform_19, window_bounds = array<i64: 1, 6>}, {pipeline_mode = #tpu.pipeline_mode<synchronous>, transform_indices = @transform_20, window_bounds = array<i64: 2, 1>}]} {
    %c0_i32 = arith.constant 0 : i32
    %0 = arith.cmpi eq, %arg0, %c0_i32 : i32
    %1 = arith.extui %0 : i1 to i32
    %c0_i32_0 = arith.constant 0 : i32
    %2 = arith.cmpi ne, %1, %c0_i32_0 : i32
    scf.if %2 {
      %c0_66 = arith.constant 0 : index
      %c0_67 = arith.constant 0 : index
      %c0_68 = arith.constant 0 : index
      %155 = vector.load %arg1[%c0_66, %c0_67, %c0_68] : memref<2x8x128xf32, #tpu.memory_space<vmem>>, vector<2x8x128xf32>
      %156 = vector.shape_cast %155 : vector<2x8x128xf32> to vector<16x128xf32>
      %c0_69 = arith.constant 0 : index
      %c0_70 = arith.constant 0 : index
      %157 = vector.load %arg22[%c0_69, %c0_70] : memref<16x128xf32, #tpu.memory_space<vmem>>, vector<16x128xf32>
      tpu.vector_store %arg22[%c0_69, %c0_70], %156 {strides = array<i32>} : memref<16x128xf32, #tpu.memory_space<vmem>>, vector<16x128xf32>,
    } else {
    }
    %c0 = arith.constant 0 : index
    %c0_1 = arith.constant 0 : index
    %3 = vector.load %arg22[%c0, %c0_1] : memref<16x128xf32, #tpu.memory_space<vmem>>, vector<16x128xf32>
    %c0_2 = arith.constant 0 : index
    %c0_3 = arith.constant 0 : index
    %c0_4 = arith.constant 0 : index
    %4 = vector.load %arg2[%c0_2, %c0_3, %c0_4] : memref<8x1x8xf32, #tpu.memory_space<vmem>>, vector<8x1x8xf32>
    %5 = arith.truncf %3 : vector<16x128xf32> to vector<16x128xbf16>
    %c0_5 = arith.constant 0 : index
    %c0_6 = arith.constant 0 : index
    %c0_7 = arith.constant 0 : index
    %6 = vector.load %arg3[%c0_5, %c0_6, %c0_7] : memref<1x128x384xbf16, #tpu.memory_space<vmem>>, vector<1x128x384xbf16>
    %7 = vector.shape_cast %6 : vector<1x128x384xbf16> to vector<128x384xbf16>
    %cst = arith.constant dense<0.000000e+00> : vector<16x384xf32>
    %8 = tpu.matmul %5, %7, %cst {dimension_numbers = #tpu.dot_dimension_numbers<[1], [0], [0], [1], [0, 0, 1, 1], [], []>} : vector<16x128xbf16>, vector<128x384xbf16>, vector<16x384xf32> -> vector<16x384xf32>
    %c0_8 = arith.constant 0 : index
    %c0_9 = arith.constant 0 : index
    %c0_10 = arith.constant 0 : index
    %9 = vector.load %arg4[%c0_8, %c0_9, %c0_10] : memref<1x1x384xf32, #tpu.memory_space<vmem>>, vector<1x1x384xf32>
    %10 = vector.shape_cast %9 : vector<1x1x384xf32> to vector<1x384xf32>
    %11 = vector.broadcast %10 : vector<1x384xf32> to vector<16x384xf32>
    %12 = arith.addf %8, %11 : vector<16x384xf32>
    %13 = vector.extract_strided_slice %12 {offsets = [0, 0], sizes = [16, 128], strides = [1, 1]} : vector<16x384xf32> to vector<16x128xf32>
    %14 = vector.shape_cast %13 : vector<16x128xf32> to vector<2x8x128xf32>
    %15 = vector.extract_strided_slice %12 {offsets = [0, 128], sizes = [16, 128], strides = [1, 1]} : vector<16x384xf32> to vector<16x128xf32>
    %16 = vector.shape_cast %15 : vector<16x128xf32> to vector<2x8x128xf32>
    %17 = vector.extract_strided_slice %12 {offsets = [0, 256], sizes = [16, 128], strides = [1, 1]} : vector<16x384xf32> to vector<16x128xf32>
    %18 = vector.shape_cast %17 : vector<16x128xf32> to vector<2x8x128xf32>
    %19 = vector.extract_strided_slice %14 {offsets = [0, 0, 0], sizes = [2, 8, 32], strides = [1, 1, 1]} : vector<2x8x128xf32> to vector<2x8x32xf32>
    %20 = vector.extract_strided_slice %14 {offsets = [0, 0, 32], sizes = [2, 8, 32], strides = [1, 1, 1]} : vector<2x8x128xf32> to vector<2x8x32xf32>
    %21 = vector.extract_strided_slice %14 {offsets = [0, 0, 64], sizes = [2, 8, 32], strides = [1, 1, 1]} : vector<2x8x128xf32> to vector<2x8x32xf32>
    %22 = vector.extract_strided_slice %14 {offsets = [0, 0, 96], sizes = [2, 8, 32], strides = [1, 1, 1]} : vector<2x8x128xf32> to vector<2x8x32xf32>
    %23 = tpu.concatenate %19, %20, %21, %22 in 0 : vector<2x8x32xf32>, vector<2x8x32xf32>, vector<2x8x32xf32>, vector<2x8x32xf32> -> vector<8x8x32xf32>
    %24 = arith.truncf %23 : vector<8x8x32xf32> to vector<8x8x32xbf16>
    %25 = vector.extract_strided_slice %16 {offsets = [0, 0, 0], sizes = [2, 8, 32], strides = [1, 1, 1]} : vector<2x8x128xf32> to vector<2x8x32xf32>
    %26 = vector.extract_strided_slice %16 {offsets = [0, 0, 32], sizes = [2, 8, 32], strides = [1, 1, 1]} : vector<2x8x128xf32> to vector<2x8x32xf32>
    %27 = vector.extract_strided_slice %16 {offsets = [0, 0, 64], sizes = [2, 8, 32], strides = [1, 1, 1]} : vector<2x8x128xf32> to vector<2x8x32xf32>
    %28 = vector.extract_strided_slice %16 {offsets = [0, 0, 96], sizes = [2, 8, 32], strides = [1, 1, 1]} : vector<2x8x128xf32> to vector<2x8x32xf32>
    %29 = tpu.concatenate %25, %26, %27, %28 in 0 : vector<2x8x32xf32>, vector<2x8x32xf32>, vector<2x8x32xf32>, vector<2x8x32xf32> -> vector<8x8x32xf32>
    %30 = arith.truncf %29 : vector<8x8x32xf32> to vector<8x8x32xbf16>
    %31 = vector.extract_strided_slice %18 {offsets = [0, 0, 0], sizes = [2, 8, 32], strides = [1, 1, 1]} : vector<2x8x128xf32> to vector<2x8x32xf32>
    %32 = vector.extract_strided_slice %18 {offsets = [0, 0, 32], sizes = [2, 8, 32], strides = [1, 1, 1]} : vector<2x8x128xf32> to vector<2x8x32xf32>
    %33 = vector.extract_strided_slice %18 {offsets = [0, 0, 64], sizes = [2, 8, 32], strides = [1, 1, 1]} : vector<2x8x128xf32> to vector<2x8x32xf32>
    %34 = vector.extract_strided_slice %18 {offsets = [0, 0, 96], sizes = [2, 8, 32], strides = [1, 1, 1]} : vector<2x8x128xf32> to vector<2x8x32xf32>
    %35 = tpu.concatenate %31, %32, %33, %34 in 0 : vector<2x8x32xf32>, vector<2x8x32xf32>, vector<2x8x32xf32>, vector<2x8x32xf32> -> vector<8x8x32xf32>
    %36 = arith.truncf %35 : vector<8x8x32xf32> to vector<8x8x32xbf16>
    "tpu.trace_start"() <{level = 10 : i32, message = "bqd,bkd->bqk"}> : () -> ()
    %cst_11 = arith.constant dense<0.000000e+00> : vector<8x8x8xf32>
    %37 = tpu.matmul %24, %30, %cst_11 {dimension_numbers = #tpu.dot_dimension_numbers<[2], [2], [1], [1], [0, 0, 0, 1, 1, 1], [0], [0]>} : vector<8x8x32xbf16>, vector<8x8x32xbf16>, vector<8x8x8xf32> -> vector<8x8x8xf32>
    "tpu.trace_stop"() : () -> ()
    %cst_12 = arith.constant 0.176776692 : f32
    %38 = vector.broadcast %cst_12 : f32 to vector<8x8x8xf32>
    %39 = arith.mulf %37, %38 : vector<8x8x8xf32>
    %40 = vector.broadcast %4 : vector<8x1x8xf32> to vector<8x8x8xf32>
    %41 = arith.addf %39, %40 : vector<8x8x8xf32>
    %cst_13 = arith.constant dense<0xFF800000> : vector<8x8xf32>
    %42 = vector.multi_reduction <maximumf>, %41, %cst_13 [2] : vector<8x8x8xf32> to vector<8x8xf32>
    %43 = vector.shape_cast %42 : vector<8x8xf32> to vector<8x8x1xf32>
    %44 = vector.broadcast %43 : vector<8x8x1xf32> to vector<8x8x8xf32>
    %45 = arith.subf %41, %44 : vector<8x8x8xf32>
    %46 = math.exp %45 : vector<8x8x8xf32>
    %cst_14 = arith.constant dense<0.000000e+00> : vector<8x8xf32>
    %47 = vector.multi_reduction <add>, %46, %cst_14 [2] : vector<8x8x8xf32> to vector<8x8xf32>
    %48 = vector.shape_cast %47 : vector<8x8xf32> to vector<8x8x1xf32>
    %49 = tpu.reciprocal %48 {approx = true} : vector<8x8x1xf32> -> vector<8x8x1xf32>
    %50 = vector.broadcast %49 : vector<8x8x1xf32> to vector<8x8x8xf32>
    %51 = arith.mulf %46, %50 : vector<8x8x8xf32>
    %52 = arith.truncf %51 : vector<8x8x8xf32> to vector<8x8x8xbf16>
    "tpu.trace_start"() <{level = 10 : i32, message = "bqk,bkd->bqd"}> : () -> ()
    %cst_15 = arith.constant dense<0.000000e+00> : vector<8x8x32xf32>
    %53 = tpu.matmul %52, %36, %cst_15 {dimension_numbers = #tpu.dot_dimension_numbers<[2], [1], [1], [2], [0, 0, 0, 1, 1, 2], [0], [0]>} : vector<8x8x8xbf16>, vector<8x8x32xbf16>, vector<8x8x32xf32> -> vector<8x8x32xf32>
    "tpu.trace_stop"() : () -> ()
    %54 = vector.extract_strided_slice %53 {offsets = [0, 0, 0], sizes = [2, 8, 32], strides = [1, 1, 1]} : vector<8x8x32xf32> to vector<2x8x32xf32>
    %55 = vector.extract_strided_slice %53 {offsets = [2, 0, 0], sizes = [2, 8, 32], strides = [1, 1, 1]} : vector<8x8x32xf32> to vector<2x8x32xf32>
    %56 = vector.extract_strided_slice %53 {offsets = [4, 0, 0], sizes = [2, 8, 32], strides = [1, 1, 1]} : vector<8x8x32xf32> to vector<2x8x32xf32>
    %57 = vector.extract_strided_slice %53 {offsets = [6, 0, 0], sizes = [2, 8, 32], strides = [1, 1, 1]} : vector<8x8x32xf32> to vector<2x8x32xf32>
    %58 = tpu.concatenate %54, %55, %56, %57 in 2 : vector<2x8x32xf32>, vector<2x8x32xf32>, vector<2x8x32xf32>, vector<2x8x32xf32> -> vector<2x8x128xf32>
    %59 = vector.shape_cast %58 : vector<2x8x128xf32> to vector<16x128xf32>
    %60 = arith.truncf %59 : vector<16x128xf32> to vector<16x128xbf16>
    %c0_16 = arith.constant 0 : index
    %c0_17 = arith.constant 0 : index
    %c0_18 = arith.constant 0 : index
    %61 = vector.load %arg5[%c0_16, %c0_17, %c0_18] : memref<1x128x128xbf16, #tpu.memory_space<vmem>>, vector<1x128x128xbf16>
    %62 = vector.shape_cast %61 : vector<1x128x128xbf16> to vector<128x128xbf16>
    %cst_19 = arith.constant dense<0.000000e+00> : vector<16x128xf32>
    %63 = tpu.matmul %60, %62, %cst_19 {dimension_numbers = #tpu.dot_dimension_numbers<[1], [0], [0], [1], [0, 0, 1, 1], [], []>} : vector<16x128xbf16>, vector<128x128xbf16>, vector<16x128xf32> -> vector<16x128xf32>
    %c0_20 = arith.constant 0 : index
    %c0_21 = arith.constant 0 : index
    %c0_22 = arith.constant 0 : index
    %64 = vector.load %arg6[%c0_20, %c0_21, %c0_22] : memref<1x1x128xf32, #tpu.memory_space<vmem>>, vector<1x1x128xf32>
    %65 = vector.shape_cast %64 : vector<1x1x128xf32> to vector<1x128xf32>
    %66 = vector.broadcast %65 : vector<1x128xf32> to vector<16x128xf32>
    %67 = arith.addf %63, %66 : vector<16x128xf32>
    %68 = arith.addf %3, %67 : vector<16x128xf32>
    %c0_23 = arith.constant 0 : index
    %c0_24 = arith.constant 0 : index
    %c0_25 = arith.constant 0 : index
    %69 = vector.load %arg7[%c0_23, %c0_24, %c0_25] : memref<1x1x128xf32, #tpu.memory_space<vmem>>, vector<1x1x128xf32>
    %70 = vector.shape_cast %69 : vector<1x1x128xf32> to vector<1x128xf32>
    %c0_26 = arith.constant 0 : index
    %c0_27 = arith.constant 0 : index
    %c0_28 = arith.constant 0 : index
    %71 = vector.load %arg8[%c0_26, %c0_27, %c0_28] : memref<1x1x128xf32, #tpu.memory_space<vmem>>, vector<1x1x128xf32>
    %72 = vector.shape_cast %71 : vector<1x1x128xf32> to vector<1x128xf32>
    %cst_29 = arith.constant dense<0.000000e+00> : vector<16xf32>
    %73 = vector.multi_reduction <add>, %68, %cst_29 [1] : vector<16x128xf32> to vector<16xf32>
    %74 = vector.shape_cast %73 : vector<16xf32> to vector<16x1xf32>
    %cst_30 = arith.constant 1.280000e+02 : f32
    %75 = vector.broadcast %cst_30 : f32 to vector<16x1xf32>
    %76 = arith.divf %74, %75 : vector<16x1xf32>
    %77 = vector.broadcast %76 : vector<16x1xf32> to vector<16x128xf32>
    %78 = arith.subf %68, %77 : vector<16x128xf32>
    %79 = arith.mulf %78, %78 : vector<16x128xf32>
    %cst_31 = arith.constant dense<0.000000e+00> : vector<16xf32>
    %80 = vector.multi_reduction <add>, %79, %cst_31 [1] : vector<16x128xf32> to vector<16xf32>
    %81 = vector.shape_cast %80 : vector<16xf32> to vector<16x1xf32>
    %cst_32 = arith.constant 1.280000e+02 : f32
    %82 = vector.broadcast %cst_32 : f32 to vector<16x1xf32>
    %83 = arith.divf %81, %82 : vector<16x1xf32>
    %84 = vector.broadcast %76 : vector<16x1xf32> to vector<16x128xf32>
    %85 = arith.subf %68, %84 : vector<16x128xf32>
    %cst_33 = arith.constant 9.99999996E-13 : f32
    %86 = vector.broadcast %cst_33 : f32 to vector<16x1xf32>
    %87 = arith.addf %83, %86 : vector<16x1xf32>
    %88 = math.rsqrt %87 : vector<16x1xf32>
    %89 = vector.broadcast %88 : vector<16x1xf32> to vector<16x128xf32>
    %90 = arith.mulf %85, %89 : vector<16x128xf32>
    %91 = vector.broadcast %70 : vector<1x128xf32> to vector<16x128xf32>
    %92 = arith.mulf %90, %91 : vector<16x128xf32>
    %93 = vector.broadcast %72 : vector<1x128xf32> to vector<16x128xf32>
    %94 = arith.addf %92, %93 : vector<16x128xf32>
    %95 = arith.truncf %94 : vector<16x128xf32> to vector<16x128xbf16>
    %c0_34 = arith.constant 0 : index
    %c0_35 = arith.constant 0 : index
    %c0_36 = arith.constant 0 : index
    %96 = vector.load %arg9[%c0_34, %c0_35, %c0_36] : memref<1x128x256xbf16, #tpu.memory_space<vmem>>, vector<1x128x256xbf16>
    %97 = vector.shape_cast %96 : vector<1x128x256xbf16> to vector<128x256xbf16>
    %cst_37 = arith.constant dense<0.000000e+00> : vector<16x256xf32>
    %98 = tpu.matmul %95, %97, %cst_37 {dimension_numbers = #tpu.dot_dimension_numbers<[1], [0], [0], [1], [0, 0, 1, 1], [], []>} : vector<16x128xbf16>, vector<128x256xbf16>, vector<16x256xf32> -> vector<16x256xf32>
    %c0_38 = arith.constant 0 : index
    %c0_39 = arith.constant 0 : index
    %c0_40 = arith.constant 0 : index
    %99 = vector.load %arg10[%c0_38, %c0_39, %c0_40] : memref<1x1x256xf32, #tpu.memory_space<vmem>>, vector<1x1x256xf32>
    %100 = vector.shape_cast %99 : vector<1x1x256xf32> to vector<1x256xf32>
    %101 = vector.broadcast %100 : vector<1x256xf32> to vector<16x256xf32>
    %102 = arith.addf %98, %101 : vector<16x256xf32>
    %cst_41 = arith.constant 5.000000e-01 : f32
    %103 = vector.broadcast %cst_41 : f32 to vector<16x256xf32>
    %104 = arith.mulf %103, %102 : vector<16x256xf32>
    %cst_42 = arith.constant 4.471500e-02 : f32
    %105 = vector.broadcast %cst_42 : f32 to vector<16x256xf32>
    %106 = arith.mulf %105, %102 : vector<16x256xf32>
    %107 = arith.mulf %106, %102 : vector<16x256xf32>
    %108 = arith.mulf %107, %102 : vector<16x256xf32>
    %109 = arith.addf %102, %108 : vector<16x256xf32>
    %cst_43 = arith.constant 0.797884583 : f32
    %110 = vector.broadcast %cst_43 : f32 to vector<16x256xf32>
    %111 = arith.mulf %110, %109 : vector<16x256xf32>
    %112 = math.tanh %111 : vector<16x256xf32>
    %cst_44 = arith.constant 1.000000e+00 : f32
    %113 = vector.broadcast %cst_44 : f32 to vector<16x256xf32>
    %114 = arith.addf %113, %112 : vector<16x256xf32>
    %115 = arith.mulf %104, %114 : vector<16x256xf32>
    %116 = arith.truncf %115 : vector<16x256xf32> to vector<16x256xbf16>
    %c0_45 = arith.constant 0 : index
    %c0_46 = arith.constant 0 : index
    %c0_47 = arith.constant 0 : index
    %117 = vector.load %arg11[%c0_45, %c0_46, %c0_47] : memref<1x256x128xbf16, #tpu.memory_space<vmem>>, vector<1x256x128xbf16>
    %118 = vector.shape_cast %117 : vector<1x256x128xbf16> to vector<256x128xbf16>
    %cst_48 = arith.constant dense<0.000000e+00> : vector<16x128xf32>
    %119 = tpu.matmul %116, %118, %cst_48 {dimension_numbers = #tpu.dot_dimension_numbers<[1], [0], [0], [1], [0, 0, 1, 1], [], []>} : vector<16x256xbf16>, vector<256x128xbf16>, vector<16x128xf32> -> vector<16x128xf32>
    %c0_49 = arith.constant 0 : index
    %c0_50 = arith.constant 0 : index
    %c0_51 = arith.constant 0 : index
    %120 = vector.load %arg12[%c0_49, %c0_50, %c0_51] : memref<1x1x128xf32, #tpu.memory_space<vmem>>, vector<1x1x128xf32>
    %121 = vector.shape_cast %120 : vector<1x1x128xf32> to vector<1x128xf32>
    %122 = vector.broadcast %121 : vector<1x128xf32> to vector<16x128xf32>
    %123 = arith.addf %119, %122 : vector<16x128xf32>
    %124 = arith.addf %94, %123 : vector<16x128xf32>
    %c0_52 = arith.constant 0 : index
    %c0_53 = arith.constant 0 : index
    %c0_54 = arith.constant 0 : index
    %125 = vector.load %arg13[%c0_52, %c0_53, %c0_54] : memref<1x1x128xf32, #tpu.memory_space<vmem>>, vector<1x1x128xf32>
    %126 = vector.shape_cast %125 : vector<1x1x128xf32> to vector<1x128xf32>
    %c0_55 = arith.constant 0 : index
    %c0_56 = arith.constant 0 : index
    %c0_57 = arith.constant 0 : index
    %127 = vector.load %arg14[%c0_55, %c0_56, %c0_57] : memref<1x1x128xf32, #tpu.memory_space<vmem>>, vector<1x1x128xf32>
    %128 = vector.shape_cast %127 : vector<1x1x128xf32> to vector<1x128xf32>
    %cst_58 = arith.constant dense<0.000000e+00> : vector<16xf32>
    %129 = vector.multi_reduction <add>, %124, %cst_58 [1] : vector<16x128xf32> to vector<16xf32>
    %130 = vector.shape_cast %129 : vector<16xf32> to vector<16x1xf32>
    %cst_59 = arith.constant 1.280000e+02 : f32
    %131 = vector.broadcast %cst_59 : f32 to vector<16x1xf32>
    %132 = arith.divf %130, %131 : vector<16x1xf32>
    %133 = vector.broadcast %132 : vector<16x1xf32> to vector<16x128xf32>
    %134 = arith.subf %124, %133 : vector<16x128xf32>
    %135 = arith.mulf %134, %134 : vector<16x128xf32>
    %cst_60 = arith.constant dense<0.000000e+00> : vector<16xf32>
    %136 = vector.multi_reduction <add>, %135, %cst_60 [1] : vector<16x128xf32> to vector<16xf32>
    %137 = vector.shape_cast %136 : vector<16xf32> to vector<16x1xf32>
    %cst_61 = arith.constant 1.280000e+02 : f32
    %138 = vector.broadcast %cst_61 : f32 to vector<16x1xf32>
    %139 = arith.divf %137, %138 : vector<16x1xf32>
    %140 = vector.broadcast %132 : vector<16x1xf32> to vector<16x128xf32>
    %141 = arith.subf %124, %140 : vector<16x128xf32>
    %cst_62 = arith.constant 9.99999996E-13 : f32
    %142 = vector.broadcast %cst_62 : f32 to vector<16x1xf32>
    %143 = arith.addf %139, %142 : vector<16x1xf32>
    %144 = math.rsqrt %143 : vector<16x1xf32>
    %145 = vector.broadcast %144 : vector<16x1xf32> to vector<16x128xf32>
    %146 = arith.mulf %141, %145 : vector<16x128xf32>
    %147 = vector.broadcast %126 : vector<1x128xf32> to vector<16x128xf32>
    %148 = arith.mulf %146, %147 : vector<16x128xf32>
    %149 = vector.broadcast %128 : vector<1x128xf32> to vector<16x128xf32>
    %150 = arith.addf %148, %149 : vector<16x128xf32>
    %c0_63 = arith.constant 0 : index
    %c0_64 = arith.constant 0 : index
    %151 = vector.load %arg22[%c0_63, %c0_64] : memref<16x128xf32, #tpu.memory_space<vmem>>, vector<16x128xf32>
    tpu.vector_store %arg22[%c0_63, %c0_64], %150 {strides = array<i32>} : memref<16x128xf32, #tpu.memory_space<vmem>>, vector<16x128xf32>,
    %c1_i32 = arith.constant 1 : i32
    %152 = arith.cmpi eq, %arg0, %c1_i32 : i32
    %153 = arith.extui %152 : i1 to i32
    %c0_i32_65 = arith.constant 0 : i32
    %154 = arith.cmpi ne, %153, %c0_i32_65 : i32
    scf.if %154 {
      %155 = vector.shape_cast %150 : vector<16x128xf32> to vector<2x8x128xf32>
      %156 = vector.extract_strided_slice %155 {offsets = [0, 0, 0], sizes = [2, 1, 128], strides = [1, 1, 1]} : vector<2x8x128xf32> to vector<2x1x128xf32>
      %157 = vector.shape_cast %156 : vector<2x1x128xf32> to vector<2x128xf32>
      %158 = arith.truncf %157 : vector<2x128xf32> to vector<2x128xbf16>
      %c0_66 = arith.constant 0 : index
      %c0_67 = arith.constant 0 : index
      %159 = vector.load %arg15[%c0_66, %c0_67] : memref<128x128xbf16, #tpu.memory_space<vmem>>, vector<128x128xbf16>
      %cst_68 = arith.constant dense<0.000000e+00> : vector<2x128xf32>
      %160 = tpu.matmul %158, %159, %cst_68 {dimension_numbers = #tpu.dot_dimension_numbers<[1], [0], [0], [1], [0, 0, 1, 1], [], []>} : vector<2x128xbf16>, vector<128x128xbf16>, vector<2x128xf32> -> vector<2x128xf32>
      %c0_69 = arith.constant 0 : index
      %c0_70 = arith.constant 0 : index
      %161 = vector.load %arg16[%c0_69, %c0_70] : memref<1x128xf32, #tpu.memory_space<vmem>>, vector<1x128xf32>
      %162 = vector.broadcast %161 : vector<1x128xf32> to vector<2x128xf32>
      %163 = arith.addf %160, %162 : vector<2x128xf32>
      %164 = math.tanh %163 : vector<2x128xf32>
      %165 = arith.truncf %164 : vector<2x128xf32> to vector<2x128xbf16>
      %c0_71 = arith.constant 0 : index
      %c0_72 = arith.constant 0 : index
      %166 = vector.load %arg17[%c0_71, %c0_72] : memref<128x64xbf16, #tpu.memory_space<vmem>>, vector<128x64xbf16>
      %cst_73 = arith.constant dense<0.000000e+00> : vector<2x64xf32>
      %167 = tpu.matmul %165, %166, %cst_73 {dimension_numbers = #tpu.dot_dimension_numbers<[1], [0], [0], [1], [0, 0, 1, 1], [], []>} : vector<2x128xbf16>, vector<128x64xbf16>, vector<2x64xf32> -> vector<2x64xf32>
      %c0_74 = arith.constant 0 : index
      %c0_75 = arith.constant 0 : index
      %168 = vector.load %arg18[%c0_74, %c0_75] : memref<1x64xf32, #tpu.memory_space<vmem>>, vector<1x64xf32>
      %169 = vector.broadcast %168 : vector<1x64xf32> to vector<2x64xf32>
      %170 = arith.addf %167, %169 : vector<2x64xf32>
      %cst_76 = arith.constant 0.000000e+00 : f32
      %171 = vector.broadcast %cst_76 : f32 to vector<2x64xf32>
      %172 = arith.maximumf %170, %171 : vector<2x64xf32>
      %173 = arith.truncf %172 : vector<2x64xf32> to vector<2x64xbf16>
      %c0_77 = arith.constant 0 : index
      %c0_78 = arith.constant 0 : index
      %174 = vector.load %arg19[%c0_77, %c0_78] : memref<64x6xbf16, #tpu.memory_space<vmem>>, vector<64x6xbf16>
      %cst_79 = arith.constant dense<0.000000e+00> : vector<2x6xf32>
      %175 = tpu.matmul %173, %174, %cst_79 {dimension_numbers = #tpu.dot_dimension_numbers<[1], [0], [0], [1], [0, 0, 1, 1], [], []>} : vector<2x64xbf16>, vector<64x6xbf16>, vector<2x6xf32> -> vector<2x6xf32>
      %c0_80 = arith.constant 0 : index
      %c0_81 = arith.constant 0 : index
      %176 = vector.load %arg20[%c0_80, %c0_81] : memref<1x6xf32, #tpu.memory_space<vmem>>, vector<1x6xf32>
      %177 = vector.broadcast %176 : vector<1x6xf32> to vector<2x6xf32>
      %178 = arith.addf %175, %177 : vector<2x6xf32>
      %cst_82 = arith.constant dense<0xFF800000> : vector<2xf32>
      %179 = vector.multi_reduction <maximumf>, %178, %cst_82 [1] : vector<2x6xf32> to vector<2xf32>
      %180 = vector.shape_cast %179 : vector<2xf32> to vector<2x1xf32>
      %181 = vector.broadcast %180 : vector<2x1xf32> to vector<2x6xf32>
      %182 = arith.subf %178, %181 : vector<2x6xf32>
      %183 = math.exp %182 : vector<2x6xf32>
      %cst_83 = arith.constant dense<0.000000e+00> : vector<2xf32>
      %184 = vector.multi_reduction <add>, %183, %cst_83 [1] : vector<2x6xf32> to vector<2xf32>
      %185 = vector.shape_cast %184 : vector<2xf32> to vector<2x1xf32>
      %186 = math.log %185 : vector<2x1xf32>
      %187 = arith.addf %186, %180 : vector<2x1xf32>
      %188 = vector.broadcast %187 : vector<2x1xf32> to vector<2x6xf32>
      %189 = arith.subf %178, %188 : vector<2x6xf32>
      %190 = tpu.iota {dimensions = array<i32: 1>} : vector<2x6xi32>
      %cst_84 = arith.constant dense<0xFF800000> : vector<2xf32>
      %191 = vector.multi_reduction <maximumf>, %189, %cst_84 [1] : vector<2x6xf32> to vector<2xf32>
      %192 = vector.shape_cast %191 : vector<2xf32> to vector<2x1xf32>
      %193 = vector.broadcast %192 : vector<2x1xf32> to vector<2x6xf32>
      %194 = arith.cmpf oeq, %189, %193 : vector<2x6xf32>
      %c6_i32 = arith.constant 6 : i32
      %195 = vector.broadcast %c6_i32 : i32 to vector<2x6xi32>
      %196 = arith.select %194, %190, %195 : vector<2x6xi1>, vector<2x6xi32>
      %cst_85 = arith.constant dense<2147483647> : vector<2xi32>
      %197 = vector.multi_reduction <minsi>, %196, %cst_85 [1] : vector<2x6xi32> to vector<2xi32>
      %198 = vector.shape_cast %197 : vector<2xi32> to vector<2x1xi32>
      %c0_86 = arith.constant 0 : index
      %c0_87 = arith.constant 0 : index
      %199 = vector.load %arg21[%c0_86, %c0_87] : memref<2x1xi32, #tpu.memory_space<vmem>>, vector<2x1xi32>
      tpu.vector_store %arg21[%c0_86, %c0_87], %198 {strides = array<i32>} : memref<2x1xi32, #tpu.memory_space<vmem>>, vector<2x1xi32>,
    } else {
    }
    return
  }
  func.func @transform_0(%arg0: i32) -> (i32, i32, i32) {
    %c0_i32 = arith.constant 0 : i32
    %c0_i32_0 = arith.constant 0 : i32
    %c0_i32_1 = arith.constant 0 : i32
    %c0_i32_2 = arith.constant 0 : i32
    return %c0_i32, %c0_i32_0, %c0_i32_1 : i32, i32, i32
  }
  func.func @transform_1(%arg0: i32) -> (i32, i32, i32) {
    %c0_i32 = arith.constant 0 : i32
    %c0_i32_0 = arith.constant 0 : i32
    %c0_i32_1 = arith.constant 0 : i32
    %c0_i32_2 = arith.constant 0 : i32
    return %c0_i32, %c0_i32_0, %c0_i32_1 : i32, i32, i32
  }
  func.func @transform_2(%arg0: i32) -> (i32, i32, i32) {
    %c0_i32 = arith.constant 0 : i32
    %c0_i32_0 = arith.constant 0 : i32
    %c0_i32_1 = arith.constant 0 : i32
    return %arg0, %c0_i32, %c0_i32_0 : i32, i32, i32
  }
  func.func @transform_3(%arg0: i32) -> (i32, i32, i32) {
    %c0_i32 = arith.constant 0 : i32
    %c0_i32_0 = arith.constant 0 : i32
    %c0_i32_1 = arith.constant 0 : i32
    return %arg0, %c0_i32, %c0_i32_0 : i32, i32, i32
  }
  func.func @transform_4(%arg0: i32) -> (i32, i32, i32) {
    %c0_i32 = arith.constant 0 : i32
    %c0_i32_0 = arith.constant 0 : i32
    %c0_i32_1 = arith.constant 0 : i32
    return %arg0, %c0_i32, %c0_i32_0 : i32, i32, i32
  }
  func.func @transform_5(%arg0: i32) -> (i32, i32, i32) {
    %c0_i32 = arith.constant 0 : i32
    %c0_i32_0 = arith.constant 0 : i32
    %c0_i32_1 = arith.constant 0 : i32
    return %arg0, %c0_i32, %c0_i32_0 : i32, i32, i32
  }
  func.func @transform_6(%arg0: i32) -> (i32, i32, i32) {
    %c0_i32 = arith.constant 0 : i32
    %c0_i32_0 = arith.constant 0 : i32
    %c0_i32_1 = arith.constant 0 : i32
    return %arg0, %c0_i32, %c0_i32_0 : i32, i32, i32
  }
  func.func @transform_7(%arg0: i32) -> (i32, i32, i32) {
    %c0_i32 = arith.constant 0 : i32
    %c0_i32_0 = arith.constant 0 : i32
    %c0_i32_1 = arith.constant 0 : i32
    return %arg0, %c0_i32, %c0_i32_0 : i32, i32, i32
  }
  func.func @transform_8(%arg0: i32) -> (i32, i32, i32) {
    %c0_i32 = arith.constant 0 : i32
    %c0_i32_0 = arith.constant 0 : i32
    %c0_i32_1 = arith.constant 0 : i32
    return %arg0, %c0_i32, %c0_i32_0 : i32, i32, i32
  }
  func.func @transform_9(%arg0: i32) -> (i32, i32, i32) {
    %c0_i32 = arith.constant 0 : i32
    %c0_i32_0 = arith.constant 0 : i32
    %c0_i32_1 = arith.constant 0 : i32
    return %arg0, %c0_i32, %c0_i32_0 : i32, i32, i32
  }
  func.func @transform_10(%arg0: i32) -> (i32, i32, i32) {
    %c0_i32 = arith.constant 0 : i32
    %c0_i32_0 = arith.constant 0 : i32
    %c0_i32_1 = arith.constant 0 : i32
    return %arg0, %c0_i32, %c0_i32_0 : i32, i32, i32
  }
  func.func @transform_11(%arg0: i32) -> (i32, i32, i32) {
    %c0_i32 = arith.constant 0 : i32
    %c0_i32_0 = arith.constant 0 : i32
    %c0_i32_1 = arith.constant 0 : i32
    return %arg0, %c0_i32, %c0_i32_0 : i32, i32, i32
  }
  func.func @transform_12(%arg0: i32) -> (i32, i32, i32) {
    %c0_i32 = arith.constant 0 : i32
    %c0_i32_0 = arith.constant 0 : i32
    %c0_i32_1 = arith.constant 0 : i32
    return %arg0, %c0_i32, %c0_i32_0 : i32, i32, i32
  }
  func.func @transform_13(%arg0: i32) -> (i32, i32, i32) {
    %c0_i32 = arith.constant 0 : i32
    %c0_i32_0 = arith.constant 0 : i32
    %c0_i32_1 = arith.constant 0 : i32
    return %arg0, %c0_i32, %c0_i32_0 : i32, i32, i32
  }
  func.func @transform_14(%arg0: i32) -> (i32, i32) {
    %c0_i32 = arith.constant 0 : i32
    %c0_i32_0 = arith.constant 0 : i32
    %c0_i32_1 = arith.constant 0 : i32
    return %c0_i32, %c0_i32_0 : i32, i32
  }
  func.func @transform_15(%arg0: i32) -> (i32, i32) {
    %c0_i32 = arith.constant 0 : i32
    %c0_i32_0 = arith.constant 0 : i32
    %c0_i32_1 = arith.constant 0 : i32
    return %c0_i32, %c0_i32_0 : i32, i32
  }
  func.func @transform_16(%arg0: i32) -> (i32, i32) {
    %c0_i32 = arith.constant 0 : i32
    %c0_i32_0 = arith.constant 0 : i32
    %c0_i32_1 = arith.constant 0 : i32
    return %c0_i32, %c0_i32_0 : i32, i32
  }
  func.func @transform_17(%arg0: i32) -> (i32, i32) {
    %c0_i32 = arith.constant 0 : i32
    %c0_i32_0 = arith.constant 0 : i32
    %c0_i32_1 = arith.constant 0 : i32
    return %c0_i32, %c0_i32_0 : i32, i32
  }
  func.func @transform_18(%arg0: i32) -> (i32, i32) {
    %c0_i32 = arith.constant 0 : i32
    %c0_i32_0 = arith.constant 0 : i32
    %c0_i32_1 = arith.constant 0 : i32
    return %c0_i32, %c0_i32_0 : i32, i32
  }
  func.func @transform_19(%arg0: i32) -> (i32, i32) {
    %c0_i32 = arith.constant 0 : i32
    %c0_i32_0 = arith.constant 0 : i32
    %c0_i32_1 = arith.constant 0 : i32
    return %c0_i32, %c0_i32_0 : i32, i32
  }
  func.func @transform_20(%arg0: i32) -> (i32, i32) {
    %c0_i32 = arith.constant 0 : i32
    %c0_i32_0 = arith.constant 0 : i32
    %c0_i32_1 = arith.constant 0 : i32
    return %c0_i32, %c0_i32_0 : i32, i32
  }
}

</mosaic_0001>

<bundles_post_ra>
// kernel: tpu_custom_call.1
= control target key start
LH: loop header
LB: loop body
LE: loop exit
PB: predicated region body
PF: predicated region fallthrough
CT: control target
= control target key end

     0   :  { %s5479_s0 = inlined_call_operand.hbm [shape: f32[2,8,128], index: 0, kind: input, shape index: {}]   ;;  %s5480_s1 = inlined_call_operand.hbm [shape: f32[8,1,8], index: 1, kind: input, shape index: {}]   ;;  %s5481_s2 = inlined_call_operand.hbm [shape: bf16[2,128,384], index: 2, kind: input, shape index: {}]   ;;  %s5482_s3 = inlined_call_operand.hbm [shape: f32[2,1,384], index: 3, kind: input, shape index: {}]   ;;  %s5483_s4 = inlined_call_operand.vmem [shape: bf16[2,128,128], index: 4, kind: input, shape index: {}]   ;;  %s5484_s5 = inlined_call_operand.hbm [shape: f32[2,1,128], index: 5, kind: input, shape index: {}]   ;;  %s5485_s6 = inlined_call_operand.hbm [shape: f32[2,1,128], index: 6, kind: input, shape index: {}]   ;;  %s5486_s7 = inlined_call_operand.hbm [shape: f32[2,1,128], index: 7, kind: input, shape index: {}]   ;;  %s5487_s8 = inlined_call_operand.hbm [shape: bf16[2,128,256], index: 8, kind: input, shape index: {}]   ;;  %s5488_s9 = inlined_call_operand.vmem [shape: f32[2,1,256], index: 9, kind: input, shape index: {}]   ;;  %s5489_s10 = inlined_call_operand.hbm [shape: bf16[2,256,128], index: 10, kind: input, shape index: {}]   ;;  %s5490_s11 = inlined_call_operand.vmem [shape: f32[2,1,128], index: 11, kind: input, shape index: {}]   ;;  %s5491_s12 = inlined_call_operand.vmem [shape: f32[2,1,128], index: 12, kind: input, shape index: {}]   ;;  %s5492_s13 = inlined_call_operand.vmem [shape: f32[2,1,128], index: 13, kind: input, shape index: {}]   ;;  %s5493_s14 = inlined_call_operand.hbm [shape: bf16[128,128], index: 14, kind: input, shape index: {}]   ;;  %s5494_s15 = inlined_call_operand.vmem [shape: f32[1,128], index: 15, kind: input, shape index: {}]   ;;  %s5495_s16 = inlined_call_operand.vmem [shape: bf16[128,64], index: 16, kind: input, shape index: {}]   ;;  %s5496_s17 = inlined_call_operand.vmem [shape: f32[1,64], index: 17, kind: input, shape index: {}]   ;;  %s5497_s18 = inlined_call_operand.vmem [shape: bf16[64,6], index: 18, kind: input, shape index: {}]   ;;  %s5498_s19 = inlined_call_operand.vmem [shape: f32[1,6], index: 19, kind: input, shape index: {}]   ;;  %s5499_s20 = inlined_call_operand.vmem [shape: s32[2,1], index: 20, kind: output, shape index: {}]  }
   0x1   :  { %5527 = sst [smem:[#allocation25_spill]] %s5479_s0 }
   0x2   :  { %5528 = sst [smem:[#allocation26_spill]] %s5480_s1 }
   0x3   :  { %5529 = sst [smem:[#allocation27_spill]] %s5481_s2 }
   0x4   :  { %5530 = sst [smem:[#allocation28_spill]] %s5482_s3 }
   0x5   :  { %5531 = sst [smem:[#allocation29_spill]] %s5483_s4 }
   0x6   :  { %5532 = sst [smem:[#allocation30_spill]] %s5484_s5 }
   0x7   :  { %5533 = sst [smem:[#allocation31_spill]] %s5485_s6 }
   0x8   :  { %5534 = sst [smem:[#allocation32_spill]] %s5486_s7 }
   0x9   :  { %5535 = sst [smem:[#allocation33_spill]] %s5487_s8 }
   0xa   :  { %5536 = sst [smem:[#allocation34_spill]] %s5488_s9 }
   0xb   :  { %5537 = sst [smem:[#allocation35_spill]] %s5489_s10 }
   0xc   :  { %5538 = sst [smem:[#allocation36_spill]] %s5490_s11 }
   0xd   :  { %5539 = sst [smem:[#allocation37_spill]] %s5491_s12 }
   0xe   :  { %5540 = sst [smem:[#allocation38_spill]] %s5492_s13 }
   0xf   :  { %5541 = sst [smem:[#allocation39_spill]] %s5493_s14 }
  0x10   :  { %5542 = sst [smem:[#allocation40_spill]] %s5494_s15 }
  0x11   :  { %5543 = sst [smem:[#allocation41_spill]] %s5495_s16 }
  0x12   :  { %5544 = sst [smem:[#allocation42_spill]] %s5496_s17 }
  0x13   :  { %5545 = sst [smem:[#allocation43_spill]] %s5497_s18 }
  0x14   :  { %5546 = sst [smem:[#allocation44_spill]] %s5498_s19 }
  0x15   :  { %5547 = sst [smem:[#allocation45_spill]] %s5499_s20 }
  0x16   :  { %25 = vsyncpa [#allocation4], 0 }
  0x17   :  { %26 = vsyncpa [#allocation6], 0  ;;  %s4647_s1 = smov 0   ;;  %s4649_s22 = smov 0  }
  0x18   :  { %s4651_s23 = smov 0   ;;  %s4653_s24 = smov 0  }
  0x19 LB: > { %5548 = sst [smem:[#allocation19_spill]] %s4506_s22  ;;  %s4666_s2 = sadd.s32 4294967295, %s4514_s24   ;;  %s4514_s24 = sphi %s4653_s24, %s5615_s24   ;;  %s4510_s23 = sphi %s4651_s23, %s5618_s23   ;;  %s4506_s22 = sphi %s4649_s22, %s5617_s22   ;;  %s4502_s1 = sphi %s4647_s1, %s5616_s1  }
  0x1a   : > { %5549 = sst [smem:[#allocation20_spill]] %s4510_s23  ;;  %s4669_s25 = sadd.s32 1, %s4514_s24  }
  0x1b   : > { %5550 = sst [smem:[#allocation21_spill]] %s4666_s2  ;;  %s78_s3 = ssub.s32 %s4514_s24, %s4669_s25 }
  0x1c   : > { %5551 = sst [smem:[#allocation22_spill]] %s4669_s25  ;;  %s81_s26 = sadd.s32 1, %s4510_s23 }
  0x1d   : > { %p79_p0 = scmp.eq.s32.totalorder %s78_s3, 0  ;;  %p88_p1 = scmp.ne.s32.totalorder %s4510_s23, %s4506_s22 }
  0x1e   : > { %p89_p2 = scmp.eq.s32.totalorder %s4514_s24, 0  ;;  %p94_p3 = scmp.ne.s32.totalorder %s4506_s22, %s4502_s1 }
  0x1f   : > { %s4679_s27 = scalar_select %p79_p0, %s4510_s23, %s81_s26  }
  0x20   : > { %p4681_p4 = por %p89_p2, %p88_p1  ;;  %p5506_p5 = scmp.eq.s32.totalorder %s4666_s2, 0 }
  0x21   : > { %5552 = sst [smem:[#allocation23_spill]] %s4679_s27  ;;  %p3410_p6 = scmp.ge.s32.totalorder %s4514_s24, 1 }
  0x22   : > { %p538_p7 = scmp.lt.s32.totalorder %s4514_s24, 3  ;;  %p4690_p8 = por %p5506_p5, %p94_p3 }
  0x23   : > { %s4516_s30 = smov [#allocation3]   ;;  %p3910_p13 = scmp.lt.s32.totalorder %s4514_s24, 2 }
  0x24   : > { %s5554_s4 = scalar_select %p4690_p8, 1, 0 }
  0x25   : > { %p4695_p10 = pnand %p3410_p6, %p538_p7  ;;  %s550_s0 = sshll.u32 %s4516_s30, 4  ;;  %s551_s0 = int_to_ptr.vmem [resolvable:$true] %s550_s0 }
  0x26   : > { %5555 = sst [smem:[#allocation24_spill]] %s5554_s4  ;;  %s4710_s3 = sand.u32 1, %s4510_s23  }
  0x27   : > { %s5556_s29 = scalar_select %p4695_p10, 1, 0 }
  0x28   : > { %p3875_p11 = pneg %p4695_p10  ;;  %p4714_p0 = pnand %p3910_p13, %p4681_p4 }
  0x29   : > { %s5559_s25 = sld [smem:[#allocation25_spill]] }
  0x2a   : > { %p4703_p12 = pnand %p3875_p11, %p5506_p5 }
  0x2b   : > { %s5558_s26 = scalar_select %p4714_p0, 1, 0 }
  0x2c   : > { %s5557_s21 = scalar_select %p4703_p12, 1, 0 }
  0x2d   : > { %p4726_p2 = pneg %p4703_p12 }
  0x2f   : > { %s4174_s20 = scalar_lea.hbm %s5559_s25, 256 }
  0x30   : > { %p4175_p1 = scmp.ne.s32.totalorder %s5559_s25, %s4174_s20  ;;  %p4181_p6 = scmp.lt.u32.totalorder %s4174_s20, %s5559_s25 }
  0x31   : > { %s5560_s15 = scalar_select %p4726_p2, 1, 0 }
  0x32   : > { %p4177_p3 = pnand %p4726_p2, %p4175_p1 }
  0x34   : > { %p4178_p4 = pneg %p4177_p3 }
  0x36   : > { %p4183_p7 = pnand %p4181_p6, %p4178_p4 }
  0x38   : > { %4186 = shalt.err (!%p4183_p7)
}
  0x39   : > { %s4187_s27 = scalar_lea.vmem %s551_s0, 256  ;;  %p4195_p5 = scmp.lt.s32.totalorder %s551_s0, %s551_s0 }
  0x3a   : > { %p4188_p11 = scmp.ne.s32.totalorder %s551_s0, %s4187_s27  ;;  %p4196_p8 = scmp.lt.s32.totalorder %s4187_s27, %s4187_s27 }
  0x3c   : > { %p4190_p13 = pnand %p4188_p11, %p4726_p2  ;;  %p4197_p10 = por %p4196_p8, %p4195_p5 }
  0x3e   : > { %p4191_p9 = pneg %p4190_p13 }
  0x40   : > { %p4198_p0 = pnand %p4197_p10, %p4191_p9 }
  0x42   : > { %4201 = shalt.err (!%p4198_p0)
}
  0x43   : > { %s5519_s17 = smov 128   ;;  %s5520_s19 = smov 8  }
  0x44   : > { %3878 = dma.hbm_to_vmem [thread:$0]  (!%p4703_p12), %s5559_s25, 256, %s551_s0, [#allocation4], %s5519_s17, %s5519_s17, %s5520_s19  }
  0x45   : > { %s3843_s30 = smul.u32 192, %s4710_s3  ;;  %s5561_s16 = sld [smem:[#allocation27_spill]] }
  0x46   : > { %s3844_s28 = smul.u32 3072, %s4514_s24  ;;  %s5562_s9 = sand.u32 1, %s4514_s24  }
  0x47   : > { %s3845_s27 = smul.u32 3, %s4710_s3  ;;  %s609_s12 = scalar_lea.vmem [#allocation7], %s3843_s30 }
  0x48   : > { %s616_s11 = sshll.u32 %s609_s12, 4  ;;  %s4757_s4 = scalar_lea.sflag [#allocation4], %s5562_s9  ;;  %s4753_s11 = int_to_ptr.vmem [resolvable:$true] %s616_s11 }
  0x49   : > { %p5563_p8 = scmp.ne.s32.totalorder %s5558_s26, 0 }
  0x4b   : > { %s4751_s13 = scalar_lea.hbm %s5561_s16, %s3844_s28  ;;  %p4763_p9 = pneg %p5563_p8 }
  0x4c   : > { %s4202_s0 = scalar_lea.hbm %s4751_s13, 3072  ;;  %s4207_s12 = scalar_lea.hbm %s5561_s16, 6144 }
  0x4d   : > { %p4203_p5 = scmp.ne.s32.totalorder %s4751_s13, %s4202_s0  ;;  %p4208_p1 = scmp.lt.u32.totalorder %s4751_s13, %s5561_s16 }
  0x4e   : > { %p4209_p3 = scmp.lt.u32.totalorder %s4207_s12, %s4202_s0  ;;  %p4211_p6 = scmp.lt.u32.totalorder %s4202_s0, %s4751_s13 }
  0x4f   : > { %p4205_p10 = pnand %p4763_p9, %p4203_p5 }
  0x50   : > { %p4210_p4 = por %p4209_p3, %p4208_p1 }
  0x51   : > { %p4206_p0 = pneg %p4205_p10 }
  0x52   : > { %p4212_p7 = por %p4211_p6, %p4210_p4 }
  0x54   : > { %p4213_p11 = pnand %p4212_p7, %p4206_p0 }
  0x56   : > { %4216 = shalt.err (!%p4213_p11)
}
  0x57   : > { %s4217_s9 = scalar_lea.vmem %s4753_s11, 3072  ;;  %s4519_s28 = smov [#allocation7]  }
  0x58   : > { %p4218_p13 = scmp.ne.s32.totalorder %s4753_s11, %s4217_s9  ;;  %s4222_s18 = sshll.u32 %s4519_s28, 4  ;;  %s4223_s18 = int_to_ptr.vmem [resolvable:$false] %s4222_s18 }
  0x59   : > { %s4224_s23 = scalar_lea.vmem %s4223_s18, 6144  ;;  %p4225_p12 = scmp.lt.s32.totalorder %s4753_s11, %s4223_s18 }
  0x5a   : > { %p4220_p5 = pnand %p4218_p13, %p4763_p9  ;;  %p4226_p2 = scmp.lt.s32.totalorder %s4224_s23, %s4217_s9 }
  0x5c   : > { %p4221_p10 = pneg %p4220_p5  ;;  %p4227_p1 = por %p4226_p2, %p4225_p12 }
  0x5e   : > { %p4228_p3 = pnand %p4227_p1, %p4221_p10 }
  0x60   : > { %4231 = shalt.err (!%p4228_p3)
}
  0x61   : > { %s4520_s0 = smov 192   ;;  %s4521_s12 = smov 12  }
  0x62   : > { %3888 = dma.hbm_to_vmem [thread:$0]  (!%p5563_p8), %s4751_s13, 3072, %s4753_s11, %s4757_s4, %s4520_s0, %s4520_s0, %s4521_s12  }
  0x63   : > { %s3846_s1 = smul.u32 48, %s4514_s24  ;;  %s630_s30 = scalar_lea.vmem [#allocation8], %s3845_s27 }
  0x64   : > { %s638_s28 = sshll.u32 %s630_s30, 4  ;;  %s5565_s23 = sld [smem:[#allocation28_spill]]  ;;  %s4790_s28 = int_to_ptr.vmem [resolvable:$true] %s638_s28 }
  0x65   : > { %s4796_s16 = sshll.u32 %s4514_s24, 4 }
  0x6a   : > { %s5566_s17 = smov %s5565_s23  ;;  %s636_s19 = scalar_lea.hbm %s5565_s23, %s3846_s1 }
  0x6b   : > { %s4232_s25 = scalar_lea.hbm %s636_s19, 48  ;;  %s4237_s11 = scalar_lea.hbm %s5566_s17, 96 }
  0x6c   : > { %p4233_p12 = scmp.ne.s32.totalorder %s636_s19, %s4232_s25  ;;  %p4238_p4 = scmp.lt.u32.totalorder %s636_s19, %s5566_s17 }
  0x6d   : > { %p4239_p6 = scmp.lt.u32.totalorder %s4237_s11, %s4232_s25  ;;  %p4241_p11 = scmp.lt.u32.totalorder %s4232_s25, %s636_s19 }
  0x6e   : > { %p4235_p2 = pnand %p4233_p12, %p4763_p9 }
  0x6f   : > { %p4240_p7 = por %p4239_p6, %p4238_p4 }
  0x70   : > { %p4236_p0 = pneg %p4235_p2 }
  0x71   : > { %p4242_p13 = por %p4241_p11, %p4240_p7 }
  0x73   : > { %p4243_p5 = pnand %p4242_p13, %p4236_p0 }
  0x75   : > { %4246 = shalt.err (!%p4243_p5)
}
  0x76   : > { %s4247_s0 = scalar_lea.vmem %s4790_s28, 48  ;;  %s4522_s22 = smov [#allocation8]  }
  0x77   : > { %p4248_p10 = scmp.ne.s32.totalorder %s4790_s28, %s4247_s0  ;;  %s4252_s2 = sshll.u32 %s4522_s22, 4  ;;  %s4253_s2 = int_to_ptr.vmem [resolvable:$false] %s4252_s2 }
  0x78   : > { %s4254_s12 = scalar_lea.vmem %s4253_s2, 96  ;;  %p4255_p12 = scmp.lt.s32.totalorder %s4790_s28, %s4253_s2 }
  0x79   : > { %p4250_p1 = pnand %p4248_p10, %p4763_p9  ;;  %p4256_p2 = scmp.lt.s32.totalorder %s4254_s12, %s4247_s0 }
  0x7b   : > { %p4251_p3 = pneg %p4250_p1  ;;  %p4257_p4 = por %p4256_p2, %p4255_p12 }
  0x7d   : > { %p4258_p6 = pnand %p4257_p4, %p4251_p3 }
  0x7f   : > { %4261 = shalt.err (!%p4258_p6)
}
  0x80   : > { %3891 = dma.hbm_to_vmem [thread:$0]  (!%p5563_p8), %s636_s19, 48, %s4790_s28, %s4757_s4  }
  0x81   : > { %s5567_s5 = sld [smem:[#allocation30_spill]]  ;;  %s656_s9 = scalar_lea.vmem [#allocation9], %s4710_s3 }
  0x82   : > { %s663_s18 = sshll.u32 %s656_s9, 4  ;;  %s664_s18 = int_to_ptr.vmem [resolvable:$true] %s663_s18 }
  0x87   : > { %s4819_s30 = scalar_lea.hbm %s5567_s5, %s4796_s16  ;;  %s4267_s19 = scalar_lea.hbm %s5567_s5, 32 }
  0x88   : > { %s4262_s23 = scalar_lea.hbm %s4819_s30, 16  ;;  %p4268_p13 = scmp.lt.u32.totalorder %s4819_s30, %s5567_s5 }
  0x89   : > { %p4263_p0 = scmp.ne.s32.totalorder %s4819_s30, %s4262_s23  ;;  %p4269_p5 = scmp.lt.u32.totalorder %s4267_s19, %s4262_s23 }
  0x8a   : > { %p4271_p1 = scmp.lt.u32.totalorder %s4262_s23, %s4819_s30 }
  0x8b   : > { %p4265_p7 = pnand %p4263_p0, %p4763_p9  ;;  %p4270_p10 = por %p4269_p5, %p4268_p13 }
  0x8d   : > { %p4266_p11 = pneg %p4265_p7  ;;  %p4272_p3 = por %p4271_p1, %p4270_p10 }
  0x8f   : > { %p4273_p12 = pnand %p4272_p3, %p4266_p11 }
  0x91   : > { %4276 = shalt.err (!%p4273_p12)
}
  0x92   : > { %s4277_s0 = scalar_lea.vmem %s664_s18, 16  ;;  %s4523_s22 = smov [#allocation9]  }
  0x93   : > { %p4278_p2 = scmp.ne.s32.totalorder %s664_s18, %s4277_s0  ;;  %s4282_s2 = sshll.u32 %s4523_s22, 4  ;;  %s4283_s2 = int_to_ptr.vmem [resolvable:$false] %s4282_s2 }
  0x94   : > { %s4284_s12 = scalar_lea.vmem %s4283_s2, 32  ;;  %p4285_p0 = scmp.lt.s32.totalorder %s664_s18, %s4283_s2 }
  0x95   : > { %p4280_p4 = pnand %p4278_p2, %p4763_p9  ;;  %p4286_p7 = scmp.lt.s32.totalorder %s4284_s12, %s4277_s0 }
  0x97   : > { %p4281_p6 = pneg %p4280_p4  ;;  %p4287_p8 = por %p4286_p7, %p4285_p0 }
  0x99   : > { %p4288_p5 = pnand %p4287_p8, %p4281_p6 }
  0x9b   : > { %4291 = shalt.err (!%p4288_p5)
}
  0x9c   : > { %p5568_p13 = scmp.ne.s32.totalorder %s5558_s26, 0  ;;  %s5569_s6 = sld [smem:[#allocation31_spill]] }
  0x9d   : > { %s673_s23 = scalar_lea.vmem [#allocation10], %s4710_s3 }
  0x9e   : > { %3894 = dma.hbm_to_vmem [thread:$0]  (!%p5568_p13), %s4819_s30, 16, %s664_s18, %s4757_s4  }
  0x9f   : > { %s680_s11 = sshll.u32 %s673_s23, 4  ;;  %s681_s11 = int_to_ptr.vmem [resolvable:$true] %s680_s11 }
  0xa2   : > { %s4844_s9 = scalar_lea.hbm %s5569_s6, %s4796_s16  ;;  %s4297_s30 = scalar_lea.hbm %s5569_s6, 32 }
  0xa3   : > { %s4292_s13 = scalar_lea.hbm %s4844_s9, 16  ;;  %p4298_p1 = scmp.lt.u32.totalorder %s4844_s9, %s5569_s6 }
  0xa4   : > { %p4293_p8 = scmp.ne.s32.totalorder %s4844_s9, %s4292_s13  ;;  %p4299_p3 = scmp.lt.u32.totalorder %s4297_s30, %s4292_s13 }
  0xa5   : > { %p4301_p2 = scmp.lt.u32.totalorder %s4292_s13, %s4844_s9 }
  0xa6   : > { %p4295_p11 = pnand %p4293_p8, %p4763_p9  ;;  %p4300_p12 = por %p4299_p3, %p4298_p1 }
  0xa8   : > { %p4296_p10 = pneg %p4295_p11  ;;  %p4302_p4 = por %p4301_p2, %p4300_p12 }
  0xaa   : > { %p4303_p6 = pnand %p4302_p4, %p4296_p10 }
  0xac   : > { %4306 = shalt.err (!%p4303_p6)
}
  0xad   : > { %s4307_s0 = scalar_lea.vmem %s681_s11, 16  ;;  %s4524_s22 = smov [#allocation10]  }
  0xae   : > { %p4308_p0 = scmp.ne.s32.totalorder %s681_s11, %s4307_s0  ;;  %s4312_s2 = sshll.u32 %s4524_s22, 4  ;;  %s4313_s2 = int_to_ptr.vmem [resolvable:$false] %s4312_s2 }
  0xaf   : > { %s4314_s12 = scalar_lea.vmem %s4313_s2, 32  ;;  %p4315_p8 = scmp.lt.s32.totalorder %s681_s11, %s4313_s2 }
  0xb0   : > { %p4310_p7 = pnand %p4308_p0, %p4763_p9  ;;  %p4316_p11 = scmp.lt.s32.totalorder %s4314_s12, %s4307_s0 }
  0xb2   : > { %p4311_p5 = pneg %p4310_p7  ;;  %p4317_p13 = por %p4316_p11, %p4315_p8 }
  0xb4   : > { %p4318_p1 = pnand %p4317_p13, %p4311_p5 }
  0xb6   : > { %4321 = shalt.err (!%p4318_p1)
}
  0xb7   : > { %p5570_p3 = scmp.ne.s32.totalorder %s5558_s26, 0  ;;  %s5571_s7 = sld [smem:[#allocation32_spill]] }
  0xb8   : > { %s690_s13 = scalar_lea.vmem [#allocation11], %s4710_s3 }
  0xb9   : > { %3897 = dma.hbm_to_vmem [thread:$0]  (!%p5570_p3), %s4844_s9, 16, %s681_s11, %s4757_s4  }
  0xba   : > { %s697_s19 = sshll.u32 %s690_s13, 4  ;;  %s698_s19 = int_to_ptr.vmem [resolvable:$true] %s697_s19 }
  0xbd   : > { %s4869_s23 = scalar_lea.hbm %s5571_s7, %s4796_s16  ;;  %s4327_s9 = scalar_lea.hbm %s5571_s7, 32 }
  0xbe   : > { %s4322_s28 = scalar_lea.hbm %s4869_s23, 16  ;;  %p4328_p2 = scmp.lt.u32.totalorder %s4869_s23, %s5571_s7 }
  0xbf   : > { %p4323_p13 = scmp.ne.s32.totalorder %s4869_s23, %s4322_s28  ;;  %p4329_p4 = scmp.lt.u32.totalorder %s4327_s9, %s4322_s28 }
  0xc0   : > { %p4331_p0 = scmp.lt.u32.totalorder %s4322_s28, %s4869_s23 }
  0xc1   : > { %p4325_p10 = pnand %p4323_p13, %p4763_p9  ;;  %p4330_p6 = por %p4329_p4, %p4328_p2 }
  0xc3   : > { %p4326_p12 = pneg %p4325_p10  ;;  %p4332_p7 = por %p4331_p0, %p4330_p6 }
  0xc5   : > { %p4333_p5 = pnand %p4332_p7, %p4326_p12 }
  0xc7   : > { %4336 = shalt.err (!%p4333_p5)
}
  0xc8   : > { %s4337_s16 = scalar_lea.vmem %s698_s19, 16  ;;  %s4525_s0 = smov [#allocation11]  }
  0xc9   : > { %p4338_p8 = scmp.ne.s32.totalorder %s698_s19, %s4337_s16  ;;  %s4342_s22 = sshll.u32 %s4525_s0, 4  ;;  %s4343_s22 = int_to_ptr.vmem [resolvable:$false] %s4342_s22 }
  0xca   : > { %s4344_s2 = scalar_lea.vmem %s4343_s22, 32  ;;  %p4345_p13 = scmp.lt.s32.totalorder %s698_s19, %s4343_s22 }
  0xcb   : > { %p4340_p11 = pnand %p4338_p8, %p4763_p9  ;;  %p4346_p10 = scmp.lt.s32.totalorder %s4344_s2, %s4337_s16 }
  0xcd   : > { %p4341_p1 = pneg %p4340_p11  ;;  %p4347_p3 = por %p4346_p10, %p4345_p13 }
  0xcf   : > { %p4348_p2 = pnand %p4347_p3, %p4341_p1 }
  0xd1   : > { %4351 = shalt.err (!%p4348_p2)
}
  0xd2   : > { %p5572_p4 = scmp.ne.s32.totalorder %s5558_s26, 0  ;;  %s4526_s12 = smov [#allocation5]  }
  0xd3   : > { %s563_s25 = sshll.u32 %s4526_s12, 4  ;;  %s5573_s28 = sld [smem:[#allocation26_spill]]  ;;  %s564_s25 = int_to_ptr.vmem [resolvable:$true] %s563_s25 }
  0xd4   : > { %3900 = dma.hbm_to_vmem [thread:$0]  (!%p5572_p4), %s4869_s23, 16, %s698_s19, %s4757_s4  }
  0xd5   : > { %p5574_p6 = scmp.ne.s32.totalorder %s5560_s15, 0 }
  0xd9   : > { %s4352_s30 = scalar_lea.hbm %s5573_s28, 128 }
  0xda   : > { %p4353_p12 = scmp.ne.s32.totalorder %s5573_s28, %s4352_s30  ;;  %p4359_p7 = scmp.lt.u32.totalorder %s4352_s30, %s5573_s28 }
  0xdc   : > { %p4355_p3 = pnand %p4353_p12, %p5574_p6 }
  0xde   : > { %p4356_p0 = pneg %p4355_p3 }
  0xe0   : > { %p4361_p5 = pnand %p4359_p7, %p4356_p0 }
  0xe2   : > { %4364 = shalt.err (!%p4361_p5)
}
  0xe3   : > { %s4365_s23 = scalar_lea.vmem %s564_s25, 128  ;;  %p4373_p13 = scmp.lt.s32.totalorder %s564_s25, %s564_s25 }
  0xe4   : > { %p4366_p8 = scmp.ne.s32.totalorder %s564_s25, %s4365_s23  ;;  %p4374_p10 = scmp.lt.s32.totalorder %s4365_s23, %s4365_s23 }
  0xe6   : > { %p4368_p11 = pnand %p4366_p8, %p5574_p6  ;;  %p4375_p2 = por %p4374_p10, %p4373_p13 }
  0xe8   : > { %p4369_p1 = pneg %p4368_p11 }
  0xea   : > { %p4376_p4 = pnand %p4375_p2, %p4369_p1 }
  0xec   : > { %4379 = shalt.err (!%p4376_p4)
}
  0xed   : > { %s4527_s19 = smov 16   ;;  %s4528_s16 = smov 1  }
  0xee   : > { %p5575_p12 = scmp.ne.s32.totalorder %s5557_s21, 0  ;;  %s3420_s2 = sshll.u32 %s4710_s3, 7 }
  0xef   : > { %s3557_s12 = sshll.u32 %s4514_s24, 11  ;;  %s5576_s8 = sld [smem:[#allocation33_spill]] }
  0xf0   : > { %3881 = dma.hbm_to_vmem [thread:$0]  (!%p5575_p12), %s5573_s28, 128, %s564_s25, [#allocation6], %s4527_s19, %s4527_s19, %s4528_s16  }
  0xf1   : > { %s708_s18 = scalar_lea.vmem [#allocation12], %s3420_s2  ;;  %s4529_s11 = smov [#allocation14]  }
  0xf2   : > { %s715_s9 = sshll.u32 %s708_s18, 4  ;;  %s4921_s27 = sshll.u32 %s4529_s11, 4  ;;  %s4919_s9 = int_to_ptr.vmem [resolvable:$true] %s715_s9  ;;  %s577_s27 = int_to_ptr.vmem [resolvable:$true] %s4921_s27 }
  0xf5   : > { %s4915_s30 = scalar_lea.hbm %s5576_s8, %s3557_s12  ;;  %s4385_s16 = scalar_lea.hbm %s5576_s8, 4096 }
  0xf6   : > { %s4380_s25 = scalar_lea.hbm %s4915_s30, 2048  ;;  %p4386_p7 = scmp.lt.u32.totalorder %s4915_s30, %s5576_s8 }
  0xf7   : > { %p4381_p4 = scmp.ne.s32.totalorder %s4915_s30, %s4380_s25  ;;  %p4387_p5 = scmp.lt.u32.totalorder %s4385_s16, %s4380_s25 }
  0xf8   : > { %p4389_p11 = scmp.lt.u32.totalorder %s4380_s25, %s4915_s30 }
  0xf9   : > { %p4383_p3 = pnand %p4381_p4, %p4763_p9  ;;  %p4388_p8 = por %p4387_p5, %p4386_p7 }
  0xfb   : > { %p4384_p0 = pneg %p4383_p3  ;;  %p4390_p1 = por %p4389_p11, %p4388_p8 }
  0xfd   : > { %p4391_p13 = pnand %p4390_p1, %p4384_p0 }
  0xff   : > { %4394 = shalt.err (!%p4391_p13)
}
 0x100   : > { %s4395_s1 = scalar_lea.vmem %s4919_s9, 2048  ;;  %s4530_s13 = smov [#allocation12]  }
 0x101   : > { %p4396_p10 = scmp.ne.s32.totalorder %s4919_s9, %s4395_s1  ;;  %s4400_s18 = sshll.u32 %s4530_s13, 4  ;;  %s4401_s18 = int_to_ptr.vmem [resolvable:$false] %s4400_s18 }
 0x102   : > { %s4402_s11 = scalar_lea.vmem %s4401_s18, 4096  ;;  %p4403_p3 = scmp.lt.s32.totalorder %s4919_s9, %s4401_s18 }
 0x103   : > { %p4398_p2 = pnand %p4396_p10, %p4763_p9  ;;  %p4404_p12 = scmp.lt.s32.totalorder %s4402_s11, %s4395_s1 }
 0x105   : > { %p4399_p4 = pneg %p4398_p2  ;;  %p4405_p7 = por %p4404_p12, %p4403_p3 }
 0x107   : > { %p4406_p5 = pnand %p4405_p7, %p4399_p4 }
 0x109   : > { %4409 = shalt.err (!%p4406_p5)
}
 0x10a   : > { %p5577_p0 = scmp.ne.s32.totalorder %s5558_s26, 0  ;;  %s5578_s25 = smov 8  }
 0x10b   : > { %s5579_s23 = smov 128   ;;  %s5580_s14 = sld [smem:[#allocation39_spill]] }
 0x10c   : > { %3903 = dma.hbm_to_vmem [thread:$0]  (!%p5577_p0), %s4915_s30, 2048, %s4919_s9, %s4757_s4, %s5579_s23, %s5579_s23, %s5578_s25  }
 0x111   : > { %s4410_s0 = scalar_lea.hbm %s5580_s14, 1024 }
 0x112   : > { %p4411_p12 = scmp.ne.s32.totalorder %s5580_s14, %s4410_s0  ;;  %p4417_p1 = scmp.lt.u32.totalorder %s4410_s0, %s5580_s14 }
 0x114   : > { %p4413_p8 = pnand %p4411_p12, %p5574_p6 }
 0x116   : > { %p4414_p11 = pneg %p4413_p8 }
 0x118   : > { %p4419_p13 = pnand %p4417_p1, %p4414_p11 }
 0x11a   : > { %4422 = shalt.err (!%p4419_p13)
}
 0x11b   : > { %s4423_s11 = scalar_lea.vmem %s577_s27, 1024  ;;  %p4431_p3 = scmp.lt.s32.totalorder %s577_s27, %s577_s27 }
 0x11c   : > { %p4424_p10 = scmp.ne.s32.totalorder %s577_s27, %s4423_s11  ;;  %p4432_p7 = scmp.lt.s32.totalorder %s4423_s11, %s4423_s11 }
 0x11e   : > { %p4426_p2 = pnand %p4424_p10, %p5574_p6  ;;  %p4433_p5 = por %p4432_p7, %p4431_p3 }
 0x120   : > { %p4427_p4 = pneg %p4426_p2 }
 0x122   : > { %p4434_p0 = pnand %p4433_p5, %p4427_p4 }
 0x124   : > { %4437 = shalt.err (!%p4434_p0)
}
 0x125   : > { %s4531_s30 = smov 64   ;;  %s4532_s9 = smov 4  }
 0x126   : > { %p5581_p12 = scmp.ne.s32.totalorder %s5557_s21, 0  ;;  %s5582_s10 = sld [smem:[#allocation35_spill]] }
 0x127   : > { %s736_s0 = scalar_lea.vmem [#allocation13], %s3420_s2 }
 0x128   : > { %3884 = dma.hbm_to_vmem [thread:$0]  (!%p5581_p12), %s5580_s14, 1024, %s577_s27, [#allocation6], %s4531_s30, %s4531_s30, %s4532_s9  }
 0x129   : > { %s743_s21 = sshll.u32 %s736_s0, 4  ;;  %s4979_s21 = int_to_ptr.vmem [resolvable:$true] %s743_s21 }
 0x12c   : > { %s4975_s16 = scalar_lea.hbm %s5582_s10, %s3557_s12  ;;  %s4443_s1 = scalar_lea.hbm %s5582_s10, 4096 }
 0x12d   : > { %s4438_s22 = scalar_lea.hbm %s4975_s16, 2048  ;;  %p4444_p11 = scmp.lt.u32.totalorder %s4975_s16, %s5582_s10 }
 0x12e   : > { %p4439_p6 = scmp.ne.s32.totalorder %s4975_s16, %s4438_s22  ;;  %p4445_p1 = scmp.lt.u32.totalorder %s4443_s1, %s4438_s22 }
 0x12f   : > { %p4447_p10 = scmp.lt.u32.totalorder %s4438_s22, %s4975_s16 }
 0x130   : > { %p4441_p0 = pnand %p4439_p6, %p4763_p9  ;;  %p4446_p13 = por %p4445_p1, %p4444_p11 }
 0x132   : > { %p4442_p8 = pneg %p4441_p0  ;;  %p4448_p2 = por %p4447_p10, %p4446_p13 }
 0x134   : > { %p4449_p4 = pnand %p4448_p2, %p4442_p8 }
 0x136   : > { %4452 = shalt.err (!%p4449_p4)
}
 0x137   : > { %s4453_s3 = scalar_lea.vmem %s4979_s21, 2048  ;;  %s4533_s2 = smov [#allocation13]  }
 0x138   : > { %p4454_p3 = scmp.ne.s32.totalorder %s4979_s21, %s4453_s3  ;;  %s4458_s18 = sshll.u32 %s4533_s2, 4  ;;  %s4459_s18 = int_to_ptr.vmem [resolvable:$false] %s4458_s18 }
 0x139   : > { %s4460_s11 = scalar_lea.vmem %s4459_s18, 4096  ;;  %p4461_p12 = scmp.lt.s32.totalorder %s4979_s21, %s4459_s18 }
 0x13a   : > { %p4456_p7 = pnand %p4454_p3, %p4763_p9  ;;  %p4462_p6 = scmp.lt.s32.totalorder %s4460_s11, %s4453_s3 }
 0x13c   : > { %p4457_p5 = pneg %p4456_p7  ;;  %p4463_p0 = por %p4462_p6, %p4461_p12 }
 0x13e   : > { %p4464_p11 = pnand %p4463_p0, %p4457_p5 }
 0x140   : > { %4467 = shalt.err (!%p4464_p11)
}
 0x141   : > { %p5583_p8 = scmp.ne.s32.totalorder %s5558_s26, 0  ;;  %p5584_p9 = scmp.ne.s32.totalorder %s5556_s29, 0 }
 0x142   : > { %s5585_s20 = sld [smem:[#allocation21_spill]] (!%p5584_p9) }
 0x143   : > { %3906 = dma.hbm_to_vmem [thread:$0]  (!%p5583_p8), %s4975_s16, 2048, %s4979_s21, %s4757_s4, %s4531_s30, %s4531_s30, %s4532_s9  }
 0x144   : > { %773 = sbr.rel (%p5584_p9) target bundleno = 4410 (0x113a), region = 100 }
 0x148   : > { %p5586_p1 = scmp.eq.s32.totalorder (!%p5584_p9), %s5585_s20, 0 }
 0x14b   : > { %4485 = dma.done.wait (%p5586_p1), [#allocation4], 256   ;;  %p5587_p13 = pmov %p5586_p1 }
 0x14c   : > { %p5588_p10 = pmov %p5586_p1 }
 0x14d   : > { %4487 = vsyncadd (%p5587_p13), [#allocation4], 4294967040 }
 0x14e   : > { %4489 = dma.done.wait (%p5588_p10), [#allocation6], 128   ;;  %p5589_p2 = pmov %p5586_p1 }
 0x14f   : > { %s5590_s26 = sld [smem:[#allocation19_spill]]  ;;  %s5591_s25 = sld [smem:[#allocation24_spill]] }
 0x150   : > { %4491 = vsyncadd (%p5589_p2), [#allocation6], 4294967168  ;;  %s783_s23 = sand.u32 1, %s5585_s20  }
 0x151   : > { %s784_s30 = scalar_lea.sflag [#allocation4], %s783_s23 }
 0x155   : > { %s5018_s4 = sand.u32 1, %s5590_s26   ;;  %p5592_p4 = scmp.ne.s32.totalorder %s5591_s25, 0 }
 0x156   : > { %s3847_s29 = smul.u32 192, %s5018_s4 }
 0x158   : > { %s5021_s9 = scalar_lea.vmem [#allocation7], %s3847_s29 }
 0x159   : > { %4493 = dma.done.wait (%p5592_p4), %s784_s30, 7264  }
 0x15a   : > { %4495 = vsyncadd (%p5592_p4), %s784_s30, 4294960032  ;;  %s3848_s15 = smul.u32 3, %s5018_s4  ;;  %s3429_s19 = sshll.u32 %s5018_s4, 7 }
 0x15b   : > { %s5034_s24 = scalar_lea.vmem [#allocation12], %s3429_s19  ;;  %s5036_s27 = scalar_lea.vmem [#allocation13], %s3429_s19 }
 0x15c   : > { %s5029_s16 = scalar_lea.vmem [#allocation8], %s3848_s15  ;;  %p5593_p3 = pmov %p5586_p1 }
 0x15d   : > { %p5594_p7 = pmov %p5586_p1 }
 0x15e   : > { %4497 = dma.done.wait (%p5593_p3), [#allocation6], 1024  }
 0x15f   : > { %4499 = vsyncadd (%p5594_p7), [#allocation6], 4294966272  ;;  %p939_p5 = scmp.lt.s32.totalorder %s5585_s20, 1  ;;  %s5595_s18 = sld [smem:[#allocation29_spill]] }
 0x160   : > { %s5596_s23 = sld [smem:[#allocation34_spill]]  ;;  %s5597_s19 = sld [smem:[#allocation36_spill]] }
 0x161   : > { %s5044_s1 = scalar_select %p939_p5, %s5585_s20, 1 }
 0x162   : > { %s5598_s5 = sld [smem:[#allocation37_spill]]  ;;  %s5599_s10 = sld [smem:[#allocation38_spill]] }
 0x163   : > { %s3559_s12 = sshll.u32 %s5044_s1, 6  ;;  %s3434_s13 = sshll.u32 %s5044_s1, 1 }
 0x164   : > { %p5600_p12 = scmp.ne.s32.totalorder %s5585_s20, 0 }
 0x165   : > { %s5051_s11 = scalar_lea.vmem %s5595_s18, %s3559_s12  ;;  %v962_v0 = vld [vmem:[#allocation3] sm:$0xff] (!%p5600_p12)  ;;  %v963_v1 = vld [vmem:[#allocation3 + $0x8] sm:$0xff] (!%p5600_p12) }
 0x166   : > { %s5056_s29 = scalar_lea.vmem %s5596_s23, %s3434_s13  ;;  %s950_s22 = scalar_lea.vmem %s5597_s19, %s5044_s1  ;;  %964 = vst [vmem:[#allocation2] sm:$0xff] (!%p5600_p12), %v962_v0  ;;  %965 = vst [vmem:[#allocation2 + $0x8] sm:$0xff] (!%p5600_p12), %v963_v1 }
 0x167   : > { %961 = sbr.rel (%p5600_p12) target bundleno = 366 (0x16e), region = 144 }
 0x168   : > { %s953_s6 = scalar_lea.vmem %s5598_s5, %s5044_s1  ;;  %s956_s14 = scalar_lea.vmem %s5599_s10, %s5044_s1 }
 0x16e PF: > { %v4020_v2 = vld [vmem:[%s5021_s9 + $0x4] ss:$12 sps:$4 sm:$0xff]   ;;  %v4022_v3 = vld [vmem:[%s5021_s9] ss:$12 sps:$4 sm:$0xff]   ;;  %v4534_v4 = vmov 0   ;;  %v4535_v5 = vmov 0.0   ;;  %v1011_v31 = vlaneseq }
 0x16f   : > { %1186 = vmatprep.mubr.bf16.mxu0 %v4534_v4  ;;  %3655 = vmatprep.subr.bf16.mxu1 %v4535_v5  ;;  %v4023_v6 = vld [vmem:[%s5021_s9 + $0x1c] ss:$12 sps:$4 sm:$0xff]   ;;  %v4025_v7 = vld [vmem:[%s5021_s9 + $0x18] ss:$12 sps:$4 sm:$0xff]   ;;  %v4026_v8 = vld [vmem:[%s5021_s9 + $0x34] ss:$12 sps:$4 sm:$0xff]  }
 0x170   : > { %1154 = vmatprep.subr.bf16.mxu0 %v4020_v2  ;;  %v4028_v9 = vld [vmem:[%s5021_s9 + $0x30] ss:$12 sps:$4 sm:$0xff]   ;;  %v4029_v10 = vld [vmem:[%s5021_s9 + $0x4c] ss:$12 sps:$4 sm:$0xff]   ;;  %v4031_v11 = vld [vmem:[%s5021_s9 + $0x48] ss:$12 sps:$4 sm:$0xff]  }
 0x171   : > { %1155 = vmatpush1.bf16.msra.mxu0 %v4022_v3  ;;  %v4032_v12 = vld [vmem:[%s5021_s9 + $0x64] ss:$12 sps:$4 sm:$0xff]   ;;  %v4044_v13 = vld [vmem:[%s5021_s9 + $0x8] ss:$12 sps:$4 sm:$0xff]   ;;  %v4045_v14 = vld [vmem:[%s5021_s9 + $0x20] ss:$12 sps:$4 sm:$0xff]  }
 0x172   : > { %1156 = vmatprep.subr.bf16.mxu0 %v4023_v6  ;;  %3656 = vmatpush3.bf16.msra.mxu1 %v4044_v13  ;;  %v4034_v15 = vld [vmem:[%s5021_s9 + $0x60] ss:$12 sps:$4 sm:$0xff]   ;;  %v4035_v16 = vld [vmem:[%s5021_s9 + $0x7c] ss:$12 sps:$4 sm:$0xff]   ;;  %v4046_v17 = vld [vmem:[%s5021_s9 + $0x38] ss:$12 sps:$4 sm:$0xff]  }
 0x173   : > { %3657 = vmatprep.subr.bf16.mxu1 %v4535_v5  ;;  %v4037_v18 = vld [vmem:[%s5021_s9 + $0x78] ss:$12 sps:$4 sm:$0xff]   ;;  %v4038_v19 = vld [vmem:[%s5021_s9 + $0x94] ss:$12 sps:$4 sm:$0xff]   ;;  %v4047_v20 = vld [vmem:[%s5021_s9 + $0x50] ss:$12 sps:$4 sm:$0xff]  }
 0x174   : > { %v4040_v21 = vld [vmem:[%s5021_s9 + $0x90] ss:$12 sps:$4 sm:$0xff]   ;;  %v4041_v22 = vld [vmem:[%s5021_s9 + $0xac] ss:$12 sps:$4 sm:$0xff]   ;;  %v4048_v23 = vld [vmem:[%s5021_s9 + $0x68] ss:$12 sps:$4 sm:$0xff]  }
 0x175   : > { %1157 = vmatpush1.bf16.msra.mxu0 %v4025_v7  ;;  %v4043_v24 = vld [vmem:[%s5021_s9 + $0xa8] ss:$12 sps:$4 sm:$0xff]   ;;  %v5098_v25 = vld [vmem:[#allocation2] sm:$0xff]  ;;  %v5100_v26 = vld [vmem:[#allocation2 + $0x8] sm:$0xff]  ;;  %vm4536_vm0 = vmmov 0   ;;  %v5120_v32 = vshrl.u32 %v1011_v31, 7 }
 0x176   : > { %1158 = vmatprep.subr.bf16.mxu0 %v4026_v8  ;;  %3658 = vmatpush3.bf16.msra.mxu1 %v4045_v14  ;;  %v4049_v27 = vld [vmem:[%s5021_s9 + $0x80] ss:$12 sps:$4 sm:$0xff]   ;;  %v976_v28 = vpack.c.bf16 %v5100_v26, %v5098_v25  ;;  %v4050_v29 = vld [vmem:[%s5021_s9 + $0x98] ss:$12 sps:$4 sm:$0xff]   ;;  %v4051_v30 = vld [vmem:[%s5021_s9 + $0xb0] ss:$12 sps:$4 sm:$0xff]  }
 0x177   : > { %3659 = vmatprep.subr.bf16.mxu1 %v4535_v5  ;;  %3671 = vmatprep.mubr.msk.bf16.mxu1 %vm4536_vm0, %v4535_v5  ;;  %v1017_v33 = vsub.s32 1, %v5120_v32  ;;  %v5124_v34 = vld [vmem:[%s5029_s16] sm:$0x7]  ;;  %v1013_v35 = vsub.s32 0, %v5120_v32  ;;  %vm1322_vm1 = vcmask 261120   ;;  %s4537_s5 = smov 96  }
 0x178   : > { %s4538_s7 = smov 64   ;;  %s4539_s8 = smov 32   ;;  %v1021_v8 = vsub.s32 2, %v5120_v32  ;;  %vm1855_vm2 = vcmask 1043456   ;;  %vm1755_vm3 = vcmask 64512   ;;  %vm2247_vm4 = vcmask 523264  }
 0x179   : > { %1159 = vmatpush1.bf16.msra.mxu0 %v4028_v9  ;;  %v1018_v36 = vrot.slane %v5124_v34, %v1017_v33  ;;  %v1014_v37 = vrot.slane %v5124_v34, %v1013_v35  ;;  %vm2250_vm5 = vcmask 785408   ;;  %s5601_s10 = scalar_lea.vmem [#allocation9], %s5018_s4  ;;  %s5602_s20 = scalar_lea.vmem [#allocation10], %s5018_s4 }
 0x17a   : > { %1160 = vmatprep.subr.bf16.mxu0 %v4029_v10  ;;  %3660 = vmatpush3.bf16.msra.mxu1 %v4046_v17  ;;  %v1022_v17 = vrot.slane %v5124_v34, %v1021_v8  ;;  %s5603_s9 = scalar_lea.vmem [#allocation11], %s5018_s4  ;;  %s5607_s3 = sld [smem:[#allocation21_spill]] }
 0x17b   : > { %3661 = vmatprep.subr.bf16.mxu1 %v4535_v5 }
 0x17d   : > { %1161 = vmatpush1.bf16.msra.mxu0 %v4031_v11 }
 0x17e   : > { %1162 = vmatprep.subr.bf16.mxu0 %v4032_v12  ;;  %3662 = vmatpush3.bf16.msra.mxu1 %v4047_v20 }
 0x17f   : > { %3663 = vmatprep.subr.bf16.mxu1 %v4535_v5 }
 0x180   : > { %p3530_p6 = scmp.ne.s32.totalorder %s5607_s3, 1 }
 0x181   : > { %1163 = vmatpush1.bf16.msra.mxu0 %v4034_v15  ;;  %vm4541_vm6 = vmmov (!%p3530_p6), 0   ;;  %s5608_s1 = sld [smem:[#allocation41_spill]] (!%p3530_p6)  ;;  %vm2853_vm7 = vcmask (!%p3530_p6), 1041409   ;;  %s5610_s16 = sld [smem:[#allocation43_spill]] (!%p3530_p6)  ;;  %vm3142_vm8 = vcmask (!%p3530_p6), 41984   ;;  %vm3178_vm11 = vcmask (!%p3530_p6), 1024  }
 0x182   : > { %1164 = vmatprep.subr.bf16.mxu0 %v4035_v16  ;;  %3664 = vmatpush3.bf16.msra.mxu1 %v4048_v23  ;;  %s5612_s18 = sld [smem:[#allocation42_spill]] (!%p3530_p6)  ;;  %s5613_s25 = sld [smem:[#allocation44_spill]] (!%p3530_p6) }
 0x183   : > { %3665 = vmatprep.subr.bf16.mxu1 %v4535_v5  ;;  %s5614_s30 = sld [smem:[#allocation45_spill]] (!%p3530_p6) }
 0x185   : > { %1165 = vmatpush1.bf16.msra.mxu0 %v4037_v18 }
 0x186   : > { %1166 = vmatprep.subr.bf16.mxu0 %v4038_v19  ;;  %3666 = vmatpush3.bf16.msra.mxu1 %v4049_v27 }
 0x187   : > { %3667 = vmatprep.subr.bf16.mxu1 %v4535_v5  ;;  %s5609_s2 = smov (!%p3530_p6), %s5608_s1 }
 0x189   : > { %1167 = vmatpush1.bf16.msra.mxu0 %v4040_v21 }
 0x18a   : > { %1168 = vmatprep.subr.bf16.mxu0 %v4041_v22  ;;  %3668 = vmatpush3.bf16.msra.mxu1 %v4050_v29 }
 0x18b   : > { %3669 = vmatprep.subr.bf16.mxu1 %v4535_v5 }
 0x18d   : > { %1169 = vmatpush1.bf16.msra.mxu0 %v4043_v24 }
 0x18e   : > { %3699 = vmatprep.subr.bf16.mxu0 %v4535_v5  ;;  %3670 = vmatpush3.bf16.msra.mxu1 %v4051_v30 }
 0x18f   : > { %3675 = vmatprep.subr.bf16.mxu1 %v4535_v5 }
 0x190   : > { %1187 = vmatmul.mubr.bf16.vlgmr.msra.gmra.mrb[0].mxu0 %v976_v28 }
 0x191   : > { %3701 = vmatprep.mubr.msk.bf16.mxu0 %vm4536_vm0, %v4535_v5  ;;  %3672 = vmatmul.mubr.bf16.vlgmr.msra.gmra.mrb[0].mxu1 %v976_v28 }
 0x192   : > { %3677 = vmatprep.mubr.msk.bf16.mxu1 %vm4536_vm0, %v4535_v5 }
 0x263   : > { %v1188_v38 = vpop.f32.mrb[0].mxu0 }
 0x264   : > { %v1190_v39 = vpop.f32.mrb[1].mxu0  ;;  %v1189_v42 = vadd.f32 %v1188_v38, %v1014_v37  ;;  %v1231_v55 = vpop.f32.mrb[0].mxu1 }
 0x265   : > { %v1191_v40 = vadd.f32 %v1190_v39, %v1018_v36  ;;  %v1192_v41 = vpop.f32.mrb[2].mxu0  ;;  %v3673_v56 = vpop.f32.mrb[1].mxu1  ;;  %v5161_v21 = vadd.f32 %v1231_v55, %v1022_v17  ;;  %v3469_v55 = vld [vmem:[#allocation5 + $0x1] ss:$0 sm:$0xff] }
 0x266   : > { %v1193_v43 = vadd.f32 %v1192_v41, %v1014_v37  ;;  %v1194_v44 = vpop.f32.mrb[3].mxu0  ;;  %v1258_v52 = vpack.c.bf16 %v1189_v42, %v1189_v42  ;;  %v1234_v57 = vpop.f32.mrb[2].mxu1 }
 0x267   : > { %v1195_v45 = vadd.f32 %v1194_v44, %v1018_v36  ;;  %1268 = vrot.lane.b32.xlu0 %v1191_v40, %s4537_s5  ;;  %v1286_v46 = vpack.c.bf16 %v1191_v40, %v1191_v40  ;;  %v3674_v58 = vpop.f32.mrb[3].mxu1  ;;  %v1314_v30 = vpack.c.bf16 %v5161_v21, %v5161_v21 }
 0x268   : > { %1242 = vrot.lane.b32.xlu1 %v1193_v43, %s4537_s5  ;;  %v3975_v47 = vpack.i.bf16 %v1193_v43, %v1189_v42  ;;  %v1259_v54 = vpack.c.bf16 %v1193_v43, %v1193_v43 }
 0x269   : > { %v1327_v48 = vsel %vm1322_vm1, %v1286_v46, 0  ;;  %v3965_v49 = vpack.i.bf16 %v1195_v45, %v1189_v42  ;;  %v3970_v50 = vpack.i.bf16 %v1195_v45, %v1191_v40  ;;  %v1287_v51 = vpack.c.bf16 %v1195_v45, %v1195_v45 }
 0x26a   : > { %3676 = vmatpush3.bf16.xpose.msra.mxu1 %v1327_v48  ;;  %v1857_v38 = vsel %vm1855_vm2, %v1314_v30, 0  ;;  %v5176_v40 = vadd.f32 %v1234_v57, %v1022_v17 }
 0x26b   : > { %3966 = vrot.lane.b32.xlu0 %v3965_v49, %s4537_s5  ;;  %3681 = vmatprep.subr.bf16.mxu1 %v4535_v5  ;;  %v1373_v53 = vsel %vm1322_vm1, %v1287_v51, 0 }
 0x26c   : > { %3971 = vrot.lane.b32.xlu1 %v3970_v50, %s4538_s7  ;;  %v1315_v43 = vpack.c.bf16 %v5176_v40, %v5176_v40 }
 0x26e   : > { %v1903_v45 = vsel %vm1855_vm2, %v1315_v43, 0 }
 0x26f   : > { %3976 = vrot.lane.b32.xlu0 %v3975_v47, %s4538_s7 }
 0x270   : > { %3981 = vrot.lane.b32.xlu1 %v3970_v50, %s4539_s8 }
 0x271   : > { %3678 = vmatmul.mubr.msk.bf16.vlgmr.msra.gmra.mrb[4].mxu1 %vm1322_vm1, %v1258_v52 }
 0x272   : > { %3682 = vmatpush3.bf16.xpose.msra.mxu1 %v1373_v53  ;;  %3683 = vmatprep.mubr.msk.bf16.mxu1 %vm4536_vm0, %v4535_v5 }
 0x273   : > { %3986 = vrot.lane.b32.xlu0 %v3975_v47, %s4539_s8  ;;  %3687 = vmatprep.subr.bf16.mxu1 %v4535_v5  ;;  %v3468_v47 = vld [vmem:[#allocation5] ss:$0 sm:$0xff] }
 0x279   : > { %3684 = vmatmul.mubr.msk.bf16.vlgmr.msra.gmra.mrb[8].mxu1 %vm1322_vm1, %v1259_v54 }
 0x27a   : > { %3689 = vmatprep.mubr.msk.bf16.mxu1 %vm4536_vm0, %v4535_v5 }
 0x2d9   : > { %v1269_v59 = vpop.permute.xlu0 %1268 }
 0x2da   : > { %v1288_v60 = vpack.c.bf16 %v1269_v59, %v1269_v59  ;;  %v1243_v61 = vpop.permute.xlu1 %1242 }
 0x2db   : > { %v1261_v22 = vpack.c.bf16 %v1243_v61, %v1243_v61 }
 0x2dc   : > { %v1419_v62 = vsel %vm1322_vm1, %v1288_v60, 0 }
 0x2dd   : > { %v3967_v63 = vpop.permute.xlu0 %3966  ;;  %3688 = vmatpush3.bf16.xpose.msra.mxu1 %v1419_v62 }
 0x2de   : > { %v3969_v0 = vunpack.i.h.bf16 %v3967_v63  ;;  %v3968_v1 = vunpack.i.l.bf16 %v3967_v63  ;;  %v3972_v2 = vpop.permute.xlu1 %3971  ;;  %3693 = vmatprep.subr.bf16.mxu1 %v4535_v5  ;;  %v3470_v63 = vld [vmem:[#allocation5 + $0x2] ss:$0 sm:$0xff] }
 0x2df   : > { %v3973_v3 = vunpack.i.l.bf16 %v3972_v2  ;;  %v3974_v14 = vunpack.i.h.bf16 %v3972_v2 }
 0x2e0   : > { %v1289_v6 = vpack.c.bf16 %v3969_v0, %v3969_v0  ;;  %v1260_v9 = vpack.c.bf16 %v3968_v1, %v3968_v1 }
 0x2e1   : > { %v1290_v7 = vpack.c.bf16 %v3973_v3, %v3973_v3  ;;  %v3977_v10 = vpop.permute.xlu0 %3976  ;;  %v1291_v19 = vpack.c.bf16 %v3974_v14, %v3974_v14 }
 0x2e2   : > { %v3982_v11 = vpop.permute.xlu1 %3981  ;;  %v1465_v15 = vsel %vm1322_vm1, %v1289_v6, 0  ;;  %v3978_v16 = vunpack.i.l.bf16 %v3977_v10  ;;  %v3979_v34 = vunpack.i.h.bf16 %v3977_v10 }
 0x2e3   : > { %v3983_v12 = vunpack.i.l.bf16 %v3982_v11  ;;  %v1511_v13 = vsel %vm1322_vm1, %v1290_v7, 0  ;;  %v3984_v27 = vunpack.i.h.bf16 %v3982_v11  ;;  %v1557_v28 = vsel %vm1322_vm1, %v1291_v19, 0 }
 0x2e4   : > { %3690 = vmatmul.mubr.msk.bf16.vlgmr.msra.gmra.mrb[12].mxu1 %vm1322_vm1, %v1260_v9  ;;  %3700 = vmatpush3.bf16.xpose.msra.mxu0 %v1511_v13  ;;  %v1262_v20 = vpack.c.bf16 %v3978_v16, %v3978_v16  ;;  %v1263_v39 = vpack.c.bf16 %v3979_v34, %v3979_v34  ;;  %v3472_v9 = vld [vmem:[#allocation5 + $0x4] ss:$0 sm:$0xff]  ;;  %v3471_v13 = vld [vmem:[#allocation5 + $0x3] ss:$0 sm:$0xff] }
 0x2e5   : > { %3694 = vmatpush3.bf16.xpose.msra.mxu1 %v1465_v15  ;;  %3695 = vmatprep.mubr.msk.bf16.mxu1 %vm4536_vm0, %v4535_v5  ;;  %v1292_v18 = vpack.c.bf16 %v3983_v12, %v3983_v12  ;;  %v3987_v23 = vpop.permute.xlu0 %3986  ;;  %v1293_v36 = vpack.c.bf16 %v3984_v27, %v3984_v27 }
 0x2e6   : > { %3711 = vmatprep.subr.bf16.mxu0 %v4535_v5  ;;  %3705 = vmatprep.subr.bf16.mxu1 %v4535_v5  ;;  %v3988_v29 = vunpack.i.l.bf16 %v3987_v23  ;;  %v3989_v42 = vunpack.i.h.bf16 %v3987_v23 }
 0x2e7   : > { %v1603_v24 = vsel %vm1322_vm1, %v1292_v18, 0  ;;  %v1649_v41 = vsel %vm1322_vm1, %v1293_v36, 0  ;;  %v3473_v36 = vld [vmem:[#allocation5 + $0x5] ss:$0 sm:$0xff] }
 0x2e8   : > { %v1264_v37 = vpack.c.bf16 %v3988_v29, %v3988_v29  ;;  %v1265_v44 = vpack.c.bf16 %v3989_v42, %v3989_v42 }
 0x2eb   : > { %3702 = vmatmul.mubr.msk.bf16.vlgmr.msra.gmra.mrb[4].mxu0 %vm1322_vm1, %v1262_v20 }
 0x2ec   : > { %3696 = vmatmul.mubr.msk.bf16.vlgmr.msra.gmra.mrb[16].mxu1 %vm1322_vm1, %v1261_v22  ;;  %3712 = vmatpush3.bf16.xpose.msra.mxu0 %v1603_v24 }
 0x2ed   : > { %3706 = vmatpush3.bf16.xpose.msra.mxu1 %v1557_v28  ;;  %3713 = vmatprep.mubr.msk.bf16.mxu0 %vm4536_vm0, %v4535_v5  ;;  %v3474_v28 = vld [vmem:[#allocation5 + $0x6] ss:$0 sm:$0xff] }
 0x2ee   : > { %3707 = vmatprep.mubr.msk.bf16.mxu1 %vm4536_vm0, %v4535_v5  ;;  %3717 = vmatprep.subr.bf16.mxu1 %v4535_v5 }
 0x2ef   : > { %3723 = vmatprep.subr.bf16.mxu0 %v4535_v5 }
 0x2f3   : > { %3714 = vmatmul.mubr.msk.bf16.vlgmr.msra.gmra.mrb[8].mxu0 %vm1322_vm1, %v1264_v37 }
 0x2f4   : > { %3708 = vmatmul.mubr.msk.bf16.vlgmr.msra.gmra.mrb[20].mxu1 %vm1322_vm1, %v1263_v39  ;;  %3724 = vmatpush3.bf16.msra.mxu0 %v1857_v38 }
 0x2f5   : > { %3718 = vmatpush3.bf16.xpose.msra.mxu1 %v1649_v41  ;;  %3719 = vmatprep.mubr.msk.bf16.mxu1 %vm4536_vm0, %v4535_v5 }
 0x2f6   : > { %3729 = vmatprep.subr.bf16.mxu1 %v4535_v5  ;;  %3725 = vmatprep.mubr.msk.bf16.mxu0 %vm4536_vm0, %v4535_v5 }
 0x2f7   : > { %3735 = vmatprep.subr.bf16.mxu0 %v4535_v5 }
 0x2fc   : > { %3720 = vmatmul.mubr.msk.bf16.vlgmr.msra.gmra.mrb[24].mxu1 %vm1322_vm1, %v1265_v44 }
 0x2fd   : > { %3730 = vmatpush3.bf16.msra.mxu1 %v1903_v45  ;;  %3731 = vmatprep.mubr.msk.bf16.mxu1 %vm4536_vm0, %v4535_v5 }
 0x2fe   : > { %3741 = vmatprep.subr.bf16.mxu1 %v4535_v5 }
 0x344   : > { %v1363_v46 = vpop.f32.mrb[4].mxu1 }
 0x345   : > { %v1691_v48 = vmul.f32 0.17677669, %v1363_v46  ;;  %v3679_v49 = vpop.f32.mrb[5].mxu1 }
 0x346   : > { %v1366_v50 = vpop.f32.mrb[6].mxu1  ;;  %v3475_v49 = vld [vmem:[#allocation5 + $0x7] ss:$0 sm:$0xff] }
 0x347   : > { %v3680_v51 = vpop.f32.mrb[7].mxu1  ;;  %v5194_v52 = vadd.f32 %v3468_v47, %v1691_v48 }
 0x349   : > { %v1756_v53 = vsel %vm1755_vm3, %v5194_v52, -inf }
 0x34a   : > { %1757 = vmax.xlane.f32.xlu1 %v1756_v53 }
 0x34c   : > { %v1409_v54 = vpop.f32.mrb[8].mxu1 }
 0x34d   : > { %v1692_v56 = vmul.f32 0.17677669, %v1409_v54  ;;  %v3685_v57 = vpop.f32.mrb[9].mxu1 }
 0x34e   : > { %v1412_v58 = vpop.f32.mrb[10].mxu1 }
 0x34f   : > { %v3686_v59 = vpop.f32.mrb[11].mxu1  ;;  %v5198_v60 = vadd.f32 %v3469_v55, %v1692_v56 }
 0x351   : > { %v1759_v61 = vsel %vm1755_vm3, %v5198_v60, -inf }
 0x352   : > { %1760 = vmax.xlane.f32.xlu0 %v1759_v61 }
 0x3b7   : > { %v1455_v62 = vpop.f32.mrb[12].mxu1 }
 0x3b8   : > { %v1693_v0 = vmul.f32 0.17677669, %v1455_v62  ;;  %v3691_v1 = vpop.f32.mrb[13].mxu1 }
 0x3b9   : > { %v1458_v2 = vpop.f32.mrb[14].mxu1 }
 0x3ba   : > { %v3692_v3 = vpop.f32.mrb[15].mxu1  ;;  %v5202_v6 = vadd.f32 %v3470_v63, %v1693_v0 }
 0x3bc   : > { %v1762_v7 = vsel %vm1755_vm3, %v5202_v6, -inf }
 0x3bd   : > { %1763 = vmax.xlane.f32.xlu0 %v1762_v7 }
 0x3be   : > { %v1547_v8 = vpop.f32.mrb[4].mxu0 }
 0x3bf   : > { %v1695_v10 = vmul.f32 0.17677669, %v1547_v8  ;;  %v1501_v11 = vpop.f32.mrb[16].mxu1  ;;  %v3703_v12 = vpop.f32.mrb[5].mxu0 }
 0x3c0   : > { %v1694_v14 = vmul.f32 0.17677669, %v1501_v11  ;;  %v3697_v15 = vpop.f32.mrb[17].mxu1  ;;  %v1550_v16 = vpop.f32.mrb[6].mxu0 }
 0x3c1   : > { %v1504_v17 = vpop.f32.mrb[18].mxu1  ;;  %v3704_v18 = vpop.f32.mrb[7].mxu0  ;;  %v1751_v19 = vadd.f32 %v3472_v9, %v1695_v10 }
 0x3c2   : > { %v3698_v20 = vpop.f32.mrb[19].mxu1  ;;  %v1750_v22 = vadd.f32 %v3471_v13, %v1694_v14 }
 0x3c3   : > { %v1768_v23 = vsel %vm1755_vm3, %v1751_v19, -inf }
 0x3c4   : > { %1769 = vmax.xlane.f32.xlu0 %v1768_v23  ;;  %v1765_v24 = vsel %vm1755_vm3, %v1750_v22, -inf }
 0x3c5   : > { %1766 = vmax.xlane.f32.xlu1 %v1765_v24 }
 0x3c6   : > { %v1639_v27 = vpop.f32.mrb[8].mxu0 }
 0x3c7   : > { %v1697_v29 = vmul.f32 0.17677669, %v1639_v27  ;;  %v1593_v30 = vpop.f32.mrb[20].mxu1  ;;  %v3715_v34 = vpop.f32.mrb[9].mxu0  ;;  %v3995_v27 = vpack.i.bf16 %v5176_v40, %v5161_v21 }
 0x3c8   : > { %v1696_v37 = vmul.f32 0.17677669, %v1593_v30  ;;  %v3709_v38 = vpop.f32.mrb[21].mxu1  ;;  %v1642_v39 = vpop.f32.mrb[10].mxu0 }
 0x3c9   : > { %v1596_v41 = vpop.f32.mrb[22].mxu1  ;;  %v3716_v42 = vpop.f32.mrb[11].mxu0  ;;  %v1753_v43 = vadd.f32 %v3474_v28, %v1697_v29 }
 0x3ca   : > { %v3710_v44 = vpop.f32.mrb[23].mxu1  ;;  %v5208_v45 = vadd.f32 %v3473_v36, %v1696_v37 }
 0x3cb   : > { %v1774_v46 = vsel %vm1755_vm3, %v1753_v43, -inf }
 0x3cc   : > { %1775 = vmax.xlane.f32.xlu0 %v1774_v46  ;;  %v1771_v47 = vsel %vm1755_vm3, %v5208_v45, -inf }
 0x3cd   : > { %1772 = vmax.xlane.f32.xlu1 %v1771_v47 }
 0x3cf   : > { %v1685_v48 = vpop.f32.mrb[24].mxu1 }
 0x3d0   : > { %v1698_v50 = vmul.f32 0.17677669, %v1685_v48  ;;  %v3721_v51 = vpop.f32.mrb[25].mxu1 }
 0x3d1   : > { %v1688_v53 = vpop.f32.mrb[26].mxu1 }
 0x3d2   : > { %v3722_v54 = vpop.f32.mrb[27].mxu1  ;;  %v5213_v55 = vadd.f32 %v3475_v49, %v1698_v50 }
 0x3d4   : > { %v1777_v56 = vsel %vm1755_vm3, %v5213_v55, -inf }
 0x3d5   : > { %1778 = vmax.xlane.f32.xlu1 %v1777_v56 }
 0x3d7   : > { %v1758_v57 = vpop.xlane.xlu1 %1757 }
 0x3d8   : > { %v1780_v58 = vsub.f32 %v5194_v52, %v1758_v57 }
 0x3da   : > { %v1788_v59 = vmul.f32 1.442695, %v1780_v58 }
 0x3dc   : > { %4100 = vpow2.f32 %v1788_v59 }
 0x3df   : > { %v1761_v61 = vpop.xlane.xlu0 %1760 }
 0x3e0   : > { %v1781_v62 = vsub.f32 %v5198_v60, %v1761_v61 }
 0x3e2   : > { %v1790_v63 = vmul.f32 1.442695, %v1781_v62 }
 0x3e4   : > { %4102 = vpow2.f32 %v1790_v63 }
 0x3e6   : > { %v4101_v0 = vpop.eup %4100 }
 0x3e7   : > { %v1804_v1 = vsel %vm1755_vm3, %v4101_v0, 0.0 }
 0x3e8   : > { %1805 = vadd.xlane.f32.xlu0 %v1804_v1 }
 0x3ee   : > { %v4103_v2 = vpop.eup %4102 }
 0x3ef   : > { %v1807_v3 = vsel %vm1755_vm3, %v4103_v2, 0.0 }
 0x3f0   : > { %1808 = vadd.xlane.f32.xlu1 %v1807_v3 }
 0x44a   : > { %v1764_v7 = vpop.xlane.xlu0 %1763 }
 0x44b   : > { %v1782_v8 = vsub.f32 %v5202_v6, %v1764_v7 }
 0x44d   : > { %v1792_v9 = vmul.f32 1.442695, %v1782_v8 }
 0x44f   : > { %4104 = vpow2.f32 %v1792_v9 }
 0x451   : > { %v1770_v52 = vpop.xlane.xlu0 %1769 }
 0x452   : > { %v1784_v10 = vsub.f32 %v1751_v19, %v1770_v52  ;;  %v1767_v11 = vpop.xlane.xlu1 %1766 }
 0x453   : > { %v1783_v12 = vsub.f32 %v1750_v22, %v1767_v11 }
 0x454   : > { %v1796_v60 = vmul.f32 1.442695, %v1784_v10 }
 0x455   : > { %v1794_v13 = vmul.f32 1.442695, %v1783_v12 }
 0x456   : > { %4106 = vpow2.f32 %v1796_v60 }
 0x457   : > { %4108 = vpow2.f32 %v1794_v13 }
 0x459   : > { %v5222_v14 = vpop.eup %4104  ;;  %v1776_v15 = vpop.xlane.xlu0 %1775 }
 0x45a   : > { %v1786_v16 = vsub.f32 %v1753_v43, %v1776_v15  ;;  %v1810_v17 = vsel %vm1755_vm3, %v5222_v14, 0.0  ;;  %v1773_v28 = vpop.xlane.xlu1 %1772 }
 0x45b   : > { %1811 = vadd.xlane.f32.xlu0 %v1810_v17  ;;  %v1785_v38 = vsub.f32 %v5208_v45, %v1773_v28 }
 0x45c   : > { %v1800_v18 = vmul.f32 1.442695, %v1786_v16 }
 0x45d   : > { %v1798_v41 = vmul.f32 1.442695, %v1785_v38 }
 0x45e   : > { %4110 = vpow2.f32 %v1800_v18 }
 0x460   : > { %v5226_v6 = vpop.eup %4106 }
 0x461   : > { %v4109_v20 = vpop.eup %4108  ;;  %v1816_v19 = vsel %vm1755_vm3, %v5226_v6, 0.0 }
 0x462   : > { %1817 = vadd.xlane.f32.xlu0 %v1816_v19  ;;  %v1813_v22 = vsel %vm1755_vm3, %v4109_v20, 0.0  ;;  %v1779_v30 = vpop.xlane.xlu1 %1778 }
 0x463   : > { %1814 = vadd.xlane.f32.xlu1 %v1813_v22  ;;  %v1787_v21 = vsub.f32 %v5213_v55, %v1779_v30 }
 0x465   : > { %v1802_v43 = vmul.f32 1.442695, %v1787_v21 }
 0x468   : > { %v5231_v23 = vpop.eup %4110 }
 0x469   : > { %v1822_v24 = vsel %vm1755_vm3, %v5231_v23, 0.0 }
 0x46a   : > { %1823 = vadd.xlane.f32.xlu0 %v1822_v24 }
 0x474   : > { %3996 = vrot.lane.b32.xlu1 %v3995_v27, %s4538_s7 }
 0x475   : > { %v1806_v29 = vpop.xlane.xlu0 %1805 }
 0x476   : > { %4112 = vrcp.f32 %v1806_v29 }
 0x47d   : > { %v1809_v34 = vpop.xlane.xlu1 %1808 }
 0x47e   : > { %4114 = vrcp.f32 %v1809_v34 }
 0x47f   : > { %4116 = vpow2.f32 %v1798_v41 }
 0x480   : > { %v4113_v36 = vpop.eup %4112  ;;  %3991 = vrot.lane.b32.xlu0 %v3995_v27, %s4537_s5  ;;  %4118 = vpow2.f32 %v1802_v43 }
 0x481   : > { %v1836_v37 = vmul.f32 %v4113_v36, %v4101_v0 }
 0x483   : > { %v1844_v39 = vpack.c.bf16 %v1836_v37, %v1836_v37 }
 0x485   : > { %3726 = vmatmul.mubr.msk.bf16.vlgmr.msra.gmra.mrb[12].mxu0 %vm1755_vm3, %v1844_v39 }
 0x486   : > { %3737 = vmatprep.mubr.msk.bf16.mxu0 %vm4536_vm0, %v4535_v5 }
 0x488   : > { %v4115_v40 = vpop.eup %4114 }
 0x489   : > { %v1837_v42 = vmul.f32 %v4115_v40, %v4103_v2  ;;  %v5247_v45 = vpop.eup %4116 }
 0x48a   : > { %v1819_v46 = vsel %vm1755_vm3, %v5247_v45, 0.0  ;;  %v5251_v47 = vpop.eup %4118 }
 0x48b   : > { %v1845_v44 = vpack.c.bf16 %v1837_v42, %v1837_v42  ;;  %v1825_v48 = vsel %vm1755_vm3, %v5251_v47, 0.0 }
 0x48d   : > { %3732 = vmatmul.mubr.msk.bf16.vlgmr.msra.gmra.mrb[28].mxu1 %vm1755_vm3, %v1845_v44 }
 0x48e   : > { %3743 = vmatprep.mubr.msk.bf16.mxu1 %vm4536_vm0, %v4535_v5 }
 0x498   : > { %1820 = vadd.xlane.f32.xlu1 %v1819_v46  ;;  %v4052_v46 = vld [vmem:[%s5051_s11] sm:$0xff]  }
 0x49c   : > { %1826 = vadd.xlane.f32.xlu1 %v1825_v48  ;;  %v4054_v48 = vld [vmem:[%s5051_s11 + $0x10] sm:$0xff]  }
 0x4ad   : > { %4001 = vrot.lane.b32.xlu1 %v3995_v27, %s4539_s8 }
 0x4e8   : > { %v1812_v49 = vpop.xlane.xlu0 %1811 }
 0x4e9   : > { %4120 = vrcp.f32 %v1812_v49 }
 0x4ef   : > { %v1818_v51 = vpop.xlane.xlu0 %1817 }
 0x4f0   : > { %v1815_v50 = vpop.xlane.xlu1 %1814 }
 0x4f1   : > { %4122 = vrcp.f32 %v1815_v50 }
 0x4f2   : > { %4124 = vrcp.f32 %v1818_v51 }
 0x4f3   : > { %v4121_v55 = vpop.eup %4120 }
 0x4f4   : > { %v3997_v54 = vpop.permute.xlu1 %3996  ;;  %v1838_v63 = vmul.f32 %v4121_v55, %v5222_v14 }
 0x4f5   : > { %v3999_v58 = vunpack.i.h.bf16 %v3997_v54  ;;  %v3998_v59 = vunpack.i.l.bf16 %v3997_v54 }
 0x4f6   : > { %v1846_v52 = vpack.c.bf16 %v1838_v63, %v1838_v63 }
 0x4f7   : > { %v1824_v53 = vpop.xlane.xlu0 %1823  ;;  %v1319_v3 = vpack.c.bf16 %v3999_v58, %v3999_v58  ;;  %v1318_v7 = vpack.c.bf16 %v3998_v59, %v3998_v59  ;;  %v4056_v59 = vld [vmem:[%s5051_s11 + $0x20] sm:$0xff]  }
 0x4f8   : > { %4126 = vrcp.f32 %v1824_v53 }
 0x4f9   : > { %v2041_v12 = vsel %vm1855_vm2, %v1318_v7, 0  ;;  %v2087_v60 = vsel %vm1855_vm2, %v1319_v3, 0  ;;  %v4059_v3 = vld [vmem:[%s5051_s11 + $0x38] sm:$0xff]  }
 0x4fb   : > { %v4123_v56 = vpop.eup %4122  ;;  %v3992_v57 = vpop.permute.xlu0 %3991 }
 0x4fc   : > { %v3994_v61 = vunpack.i.h.bf16 %v3992_v57  ;;  %v3993_v62 = vunpack.i.l.bf16 %v3992_v57  ;;  %v1839_v0 = vmul.f32 %v4123_v56, %v4109_v20  ;;  %v4125_v11 = vpop.eup %4124  ;;  %v4055_v56 = vld [vmem:[%s5051_s11 + $0x18] sm:$0xff]  }
 0x4fd   : > { %v1840_v13 = vmul.f32 %v4125_v11, %v5226_v6 }
 0x4fe   : > { %v1317_v1 = vpack.c.bf16 %v3994_v61, %v3994_v61  ;;  %v1316_v2 = vpack.c.bf16 %v3993_v62, %v3993_v62  ;;  %v1847_v10 = vpack.c.bf16 %v1839_v0, %v1839_v0 }
 0x4ff   : > { %v1848_v14 = vpack.c.bf16 %v1840_v13, %v1840_v13 }
 0x500   : > { %v1949_v8 = vsel %vm1855_vm2, %v1316_v2, 0  ;;  %v1995_v9 = vsel %vm1855_vm2, %v1317_v1, 0  ;;  %v4057_v1 = vld [vmem:[%s5051_s11 + $0x28] sm:$0xff]   ;;  %v4058_v2 = vld [vmem:[%s5051_s11 + $0x30] sm:$0xff]  }
 0x501   : > { %3736 = vmatpush3.bf16.msra.mxu0 %v1949_v8  ;;  %3742 = vmatpush3.bf16.msra.mxu1 %v1995_v9 }
 0x502   : > { %3747 = vmatprep.subr.bf16.mxu0 %v4535_v5  ;;  %3753 = vmatprep.subr.bf16.mxu1 %v4535_v5  ;;  %v4127_v17 = vpop.eup %4126 }
 0x503   : > { %v1842_v22 = vmul.f32 %v4127_v17, %v5231_v23 }
 0x504   : > { %3738 = vmatmul.mubr.msk.bf16.vlgmr.msra.gmra.mrb[16].mxu0 %vm1755_vm3, %v1846_v52  ;;  %3744 = vmatmul.mubr.msk.bf16.vlgmr.msra.gmra.mrb[32].mxu1 %vm1755_vm3, %v1847_v10 }
 0x505   : > { %3748 = vmatpush3.bf16.msra.mxu0 %v2041_v12  ;;  %3754 = vmatpush3.bf16.msra.mxu1 %v2087_v60  ;;  %v1850_v36 = vpack.c.bf16 %v1842_v22, %v1842_v22 }
 0x506   : > { %3749 = vmatprep.mubr.msk.bf16.mxu0 %vm4536_vm0, %v4535_v5  ;;  %3759 = vmatprep.subr.bf16.mxu0 %v4535_v5 }
 0x507   : > { %3755 = vmatprep.mubr.msk.bf16.mxu1 %vm4536_vm0, %v4535_v5  ;;  %3765 = vmatprep.subr.bf16.mxu1 %v4535_v5 }
 0x50c   : > { %3750 = vmatmul.mubr.msk.bf16.vlgmr.msra.gmra.mrb[20].mxu0 %vm1755_vm3, %v1848_v14 }
 0x50d   : > { %3761 = vmatprep.mubr.msk.bf16.mxu0 %vm4536_vm0, %v4535_v5 }
 0x525   : > { %v1821_v15 = vpop.xlane.xlu1 %1820 }
 0x526   : > { %4128 = vrcp.f32 %v1821_v15 }
 0x529   : > { %v1827_v16 = vpop.xlane.xlu1 %1826 }
 0x52a   : > { %4130 = vrcp.f32 %v1827_v16 }
 0x52d   : > { %v4002_v18 = vpop.permute.xlu1 %4001 }
 0x52e   : > { %v4004_v6 = vunpack.i.h.bf16 %v4002_v18  ;;  %v4003_v20 = vunpack.i.l.bf16 %v4002_v18 }
 0x530   : > { %v4129_v19 = vpop.eup %4128  ;;  %v1320_v24 = vpack.c.bf16 %v4003_v20, %v4003_v20  ;;  %v1321_v28 = vpack.c.bf16 %v4004_v6, %v4004_v6 }
 0x531   : > { %v1841_v27 = vmul.f32 %v4129_v19, %v5247_v45 }
 0x532   : > { %v2133_v29 = vsel %vm1855_vm2, %v1320_v24, 0  ;;  %v2179_v37 = vsel %vm1855_vm2, %v1321_v28, 0 }
 0x533   : > { %3760 = vmatpush3.bf16.msra.mxu0 %v2133_v29  ;;  %v1849_v30 = vpack.c.bf16 %v1841_v27, %v1841_v27 }
 0x534   : > { %v4131_v34 = vpop.eup %4130  ;;  %3771 = vmatprep.subr.bf16.mxu0 %v4535_v5 }
 0x535   : > { %3756 = vmatmul.mubr.msk.bf16.vlgmr.msra.gmra.mrb[36].mxu1 %vm1755_vm3, %v1849_v30  ;;  %v1843_v23 = vmul.f32 %v4131_v34, %v5251_v47  ;;  %v4053_v47 = vld [vmem:[%s5051_s11 + $0x8] sm:$0xff]  }
 0x536   : > { %3766 = vmatpush3.bf16.msra.mxu1 %v2179_v37  ;;  %3762 = vmatmul.mubr.msk.bf16.vlgmr.msra.gmra.mrb[24].mxu0 %vm1755_vm3, %v1850_v36 }
 0x537   : > { %3767 = vmatprep.mubr.msk.bf16.mxu1 %vm4536_vm0, %v4535_v5  ;;  %3787 = vmatprep.mubr.msk.bf16.mxu0 %vm4536_vm0, %v4535_v5  ;;  %v1851_v38 = vpack.c.bf16 %v1843_v23, %v1843_v23 }
 0x538   : > { %3772 = vmatpush3.bf16.msra.mxu0 %v4052_v46 }
 0x539   : > { %3773 = vmatprep.subr.bf16.mxu0 %v4535_v5 }
 0x53c   : > { %3774 = vmatpush3.bf16.msra.mxu0 %v4053_v47 }
 0x53d   : > { %3768 = vmatmul.mubr.msk.bf16.vlgmr.msra.gmra.mrb[40].mxu1 %vm1755_vm3, %v1851_v38  ;;  %3775 = vmatprep.subr.bf16.mxu0 %v4535_v5 }
 0x53e   : > { %2550 = vmatprep.mubr.bf16.mxu1 %v4534_v4 }
 0x540   : > { %3776 = vmatpush3.bf16.msra.mxu0 %v4054_v48  ;;  %v4060_v48 = vld [vmem:[%s5034_s24] ss:$8 sps:$4 sm:$0xff]  }
 0x541   : > { %3777 = vmatprep.subr.bf16.mxu0 %v4535_v5 }
 0x544   : > { %3778 = vmatpush3.bf16.msra.mxu0 %v4055_v56 }
 0x545   : > { %3779 = vmatprep.subr.bf16.mxu0 %v4535_v5 }
 0x548   : > { %3780 = vmatpush3.bf16.msra.mxu0 %v4056_v59  ;;  %v4066_v59 = vld [vmem:[%s5034_s24 + $0x20] ss:$8 sps:$4 sm:$0xff]  }
 0x549   : > { %3781 = vmatprep.subr.bf16.mxu0 %v4535_v5 }
 0x54c   : > { %3782 = vmatpush3.bf16.msra.mxu0 %v4057_v1  ;;  %v4077_v1 = vld [vmem:[%s5034_s24 + $0x54] ss:$8 sps:$4 sm:$0xff]  }
 0x54d   : > { %3783 = vmatprep.subr.bf16.mxu0 %v4535_v5 }
 0x550   : > { %3784 = vmatpush3.bf16.msra.mxu0 %v4058_v2  ;;  %v4075_v2 = vld [vmem:[%s5034_s24 + $0x50] ss:$8 sps:$4 sm:$0xff]  }
 0x551   : > { %3785 = vmatprep.subr.bf16.mxu0 %v4535_v5 }
 0x554   : > { %3786 = vmatpush3.bf16.msra.mxu0 %v4059_v3  ;;  %v4080_v3 = vld [vmem:[%s5034_s24 + $0x64] ss:$8 sps:$4 sm:$0xff]  }
 0x558   : > { %v5289_v39 = vpop.f32.mrb[12].mxu0 }
 0x559   : > { %v3727_v41 = vpop.f32.mrb[13].mxu0 }
 0x55a   : > { %v1896_v21 = vpop.f32.mrb[14].mxu0 }
 0x55b   : > { %v3728_v40 = vpop.f32.mrb[15].mxu0  ;;  %v3484_v21 = vld [vmem:[%s5601_s10] ss:$0 sm:$0xff] }
 0x560   : > { %v5291_v42 = vpop.f32.mrb[28].mxu1 }
 0x561   : > { %v3733_v43 = vpop.f32.mrb[29].mxu1 }
 0x562   : > { %v1942_v44 = vpop.f32.mrb[30].mxu1 }
 0x563   : > { %v3734_v45 = vpop.f32.mrb[31].mxu1 }
 0x5d7   : > { %v1985_v4 = vpop.f32.mrb[16].mxu0  ;;  %v2031_v49 = vpop.f32.mrb[32].mxu1 }
 0x5d8   : > { %v4005_v50 = vpack.i.bf16 %v2031_v49, %v1985_v4  ;;  %v3739_v51 = vpop.f32.mrb[17].mxu0  ;;  %v3745_v53 = vpop.f32.mrb[33].mxu1  ;;  %v4062_v4 = vld [vmem:[%s5034_s24 + $0x4] ss:$8 sps:$4 sm:$0xff]   ;;  %v4065_v49 = vld [vmem:[%s5034_s24 + $0x14] ss:$8 sps:$4 sm:$0xff]  }
 0x5d9   : > { %v1988_v54 = vpop.f32.mrb[18].mxu0  ;;  %v2034_v55 = vpop.f32.mrb[34].mxu1  ;;  %2518 = vmatprep.subr.bf16.mxu1 %v4062_v4 }
 0x5da   : > { %v3740_v57 = vpop.f32.mrb[19].mxu0  ;;  %4006 = vrot.lane.b32.xlu0 %v4005_v50, %s4539_s8  ;;  %v3746_v58 = vpop.f32.mrb[35].mxu1  ;;  %2519 = vmatpush1.bf16.msra.mxu1 %v4060_v48  ;;  %v4063_v50 = vld [vmem:[%s5034_s24 + $0x10] ss:$8 sps:$4 sm:$0xff]  }
 0x5db   : > { %2520 = vmatprep.subr.bf16.mxu1 %v4065_v49  ;;  %v4068_v58 = vld [vmem:[%s5034_s24 + $0x24] ss:$8 sps:$4 sm:$0xff]  }
 0x5de   : > { %2521 = vmatpush1.bf16.msra.mxu1 %v4063_v50 }
 0x5df   : > { %v2077_v61 = vpop.f32.mrb[20].mxu0  ;;  %2522 = vmatprep.subr.bf16.mxu1 %v4068_v58 }
 0x5e0   : > { %v3751_v62 = vpop.f32.mrb[21].mxu0 }
 0x5e1   : > { %v2080_v63 = vpop.f32.mrb[22].mxu0  ;;  %v4069_v62 = vld [vmem:[%s5034_s24 + $0x30] ss:$8 sps:$4 sm:$0xff]  }
 0x5e2   : > { %v3752_v0 = vpop.f32.mrb[23].mxu0  ;;  %2523 = vmatpush1.bf16.msra.mxu1 %v4066_v59  ;;  %v4074_v63 = vld [vmem:[%s5034_s24 + $0x44] ss:$8 sps:$4 sm:$0xff]  }
 0x5e3   : > { %v4072_v0 = vld [vmem:[%s5034_s24 + $0x40] ss:$8 sps:$4 sm:$0xff]  }
 0x608   : > { %v2123_v7 = vpop.f32.mrb[36].mxu1 }
 0x609   : > { %v4010_v8 = vpack.i.bf16 %v2123_v7, %v2077_v61  ;;  %v3757_v9 = vpop.f32.mrb[37].mxu1  ;;  %v2169_v52 = vpop.f32.mrb[24].mxu0  ;;  %v4071_v61 = vld [vmem:[%s5034_s24 + $0x34] ss:$8 sps:$4 sm:$0xff]   ;;  %v4078_v7 = vld [vmem:[%s5034_s24 + $0x60] ss:$8 sps:$4 sm:$0xff]  }
 0x60a   : > { %v2126_v10 = vpop.f32.mrb[38].mxu1  ;;  %v3763_v11 = vpop.f32.mrb[25].mxu0  ;;  %2524 = vmatprep.subr.bf16.mxu1 %v4071_v61  ;;  %v4081_v9 = vld [vmem:[%s5034_s24 + $0x70] ss:$8 sps:$4 sm:$0xff]  }
 0x60b   : > { %v2172_v12 = vpop.f32.mrb[26].mxu0  ;;  %4011 = vrot.lane.b32.xlu1 %v4010_v8, %s4538_s7  ;;  %v3758_v60 = vpop.f32.mrb[39].mxu1  ;;  %2525 = vmatpush1.bf16.msra.mxu1 %v4069_v62  ;;  %v4083_v8 = vld [vmem:[%s5034_s24 + $0x74] ss:$8 sps:$4 sm:$0xff]  }
 0x60c   : > { %v3764_v13 = vpop.f32.mrb[27].mxu0  ;;  %2526 = vmatprep.subr.bf16.mxu1 %v4074_v63 }
 0x60f   : > { %2527 = vmatpush1.bf16.msra.mxu1 %v4072_v0 }
 0x610   : > { %v2215_v14 = vpop.f32.mrb[40].mxu1  ;;  %2528 = vmatprep.subr.bf16.mxu1 %v4077_v1 }
 0x611   : > { %v4015_v15 = vpack.i.bf16 %v2215_v14, %v2169_v52  ;;  %v3769_v16 = vpop.f32.mrb[41].mxu1 }
 0x612   : > { %v2218_v17 = vpop.f32.mrb[42].mxu1 }
 0x613   : > { %4016 = vrot.lane.b32.xlu0 %v4015_v15, %s4537_s5  ;;  %v3770_v5 = vpop.f32.mrb[43].mxu1  ;;  %2529 = vmatpush1.bf16.msra.mxu1 %v4075_v2  ;;  %v3493_v15 = vld [vmem:[%s5602_s20] ss:$0 sm:$0xff] }
 0x614   : > { %2530 = vmatprep.subr.bf16.mxu1 %v4080_v3 }
 0x617   : > { %2531 = vmatpush1.bf16.msra.mxu1 %v4078_v7 }
 0x618   : > { %2532 = vmatprep.subr.bf16.mxu1 %v4083_v8 }
 0x61b   : > { %2533 = vmatpush1.bf16.msra.mxu1 %v4081_v9 }
 0x64c   : > { %v4007_v18 = vpop.permute.xlu0 %4006 }
 0x64d   : > { %v4009_v20 = vunpack.i.h.bf16 %v4007_v18  ;;  %v4008_v19 = vunpack.i.l.bf16 %v4007_v18 }
 0x64f   : > { %v2246_v28 = vsel %vm1322_vm1, %v5291_v42, %v4009_v20  ;;  %v2245_v29 = vsel %vm1322_vm1, %v5289_v39, %v4008_v19 }
 0x67d   : > { %v4012_v6 = vpop.permute.xlu1 %4011 }
 0x67e   : > { %v4014_v22 = vunpack.i.h.bf16 %v4012_v6  ;;  %v4013_v24 = vunpack.i.l.bf16 %v4012_v6  ;;  %v3494_v6 = vld [vmem:[%s5603_s9] ss:$0 sm:$0xff] }
 0x680   : > { %v2249_v36 = vsel %vm2247_vm4, %v2246_v28, %v4014_v22  ;;  %v2248_v37 = vsel %vm2247_vm4, %v2245_v29, %v4013_v24  ;;  %v4085_v28 = vld [vmem:[%s5036_s27] sm:$0xff]   ;;  %v4086_v29 = vld [vmem:[%s5036_s27 + $0x48] sm:$0xff]  }
 0x685   : > { %v4017_v27 = vpop.permute.xlu0 %4016 }
 0x686   : > { %v4019_v30 = vunpack.i.h.bf16 %v4017_v27  ;;  %v4018_v34 = vunpack.i.l.bf16 %v4017_v27  ;;  %v4084_v27 = vld [vmem:[%s5036_s27 + $0x40] sm:$0xff]  }
 0x687   : > { %3610 = vmatprep.subr.bf16.mxu0 %v4084_v27 }
 0x688   : > { %v2252_v23 = vsel %vm2250_vm5, %v2249_v36, %v4019_v30  ;;  %v2251_v38 = vsel %vm2250_vm5, %v2248_v37, %v4018_v34  ;;  %v4087_v30 = vld [vmem:[%s5036_s27 + $0x8] sm:$0xff]   ;;  %v4088_v34 = vld [vmem:[%s5036_s27 + $0x50] sm:$0xff]   ;;  %v4090_v37 = vld [vmem:[%s5036_s27 + $0x58] sm:$0xff]  }
 0x689   : > { %v2253_v41 = vpack.c.bf16 %v2252_v23, %v2251_v38  ;;  %v4089_v36 = vld [vmem:[%s5036_s27 + $0x10] sm:$0xff]   ;;  %v4091_v23 = vld [vmem:[%s5036_s27 + $0x18] sm:$0xff]   ;;  %v4092_v38 = vld [vmem:[%s5036_s27 + $0x60] sm:$0xff]  }
 0x68b   : > { %3788 = vmatmul.mubr.bf16.vlgmr.msra.gmra.mrb[28].mxu0 %v2253_v41  ;;  %v4093_v41 = vld [vmem:[%s5036_s27 + $0x20] sm:$0xff]  }
 0x68c   : > { %3611 = vmatpush3.bf16.msra.mxu0 %v4085_v28 }
 0x68d   : > { %3612 = vmatprep.subr.bf16.mxu0 %v4086_v29 }
 0x690   : > { %3613 = vmatpush3.bf16.msra.mxu0 %v4087_v30 }
 0x691   : > { %3614 = vmatprep.subr.bf16.mxu0 %v4088_v34 }
 0x694   : > { %3615 = vmatpush3.bf16.msra.mxu0 %v4089_v36  ;;  %v3511_v36 = vld [vmem:[%s950_s22] ss:$0 sm:$0xff] }
 0x695   : > { %3616 = vmatprep.subr.bf16.mxu0 %v4090_v37 }
 0x698   : > { %3617 = vmatpush3.bf16.msra.mxu0 %v4091_v23 }
 0x699   : > { %3618 = vmatprep.subr.bf16.mxu0 %v4092_v38 }
 0x69c   : > { %3619 = vmatpush3.bf16.msra.mxu0 %v4093_v41 }
 0x75e   : > { %v2359_v40 = vpop.f32.mrb[28].mxu0 }
 0x75f   : > { %v2360_v42 = vadd.f32 %v3484_v21, %v2359_v40  ;;  %v3789_v43 = vpop.f32.mrb[29].mxu0  ;;  %v4095_v40 = vld [vmem:[%s5036_s27 + $0x28] sm:$0xff]  }
 0x760   : > { %v2362_v39 = vpop.f32.mrb[30].mxu0  ;;  %v4097_v43 = vld [vmem:[%s5036_s27 + $0x30] sm:$0xff]  }
 0x761   : > { %v2363_v44 = vadd.f32 %v3484_v21, %v2362_v39  ;;  %v3790_v45 = vpop.f32.mrb[31].mxu0  ;;  %v2366_v46 = vadd.f32 %v2360_v42, %v5098_v25  ;;  %v4094_v21 = vld [vmem:[%s5036_s27 + $0x68] sm:$0xff]   ;;  %v4096_v42 = vld [vmem:[%s5036_s27 + $0x70] sm:$0xff]   ;;  %v4098_v39 = vld [vmem:[%s5036_s27 + $0x78] sm:$0xff]  }
 0x762   : > { %3620 = vmatprep.subr.bf16.mxu0 %v4094_v21  ;;  %v2426_v45 = vld [vmem:[%s5056_s29] sm:$0x3] }
 0x763   : > { %2370 = vadd.xlane.f32.xlu1 %v2366_v46  ;;  %v2367_v47 = vadd.f32 %v2363_v44, %v5100_v26  ;;  %3621 = vmatpush3.bf16.msra.mxu0 %v4095_v40  ;;  %v4099_v44 = vld [vmem:[%s5036_s27 + $0x38] sm:$0xff]   ;;  %s5611_s27 = sld [smem:[#allocation40_spill]] (!%p3530_p6) }
 0x764   : > { %3622 = vmatprep.subr.bf16.mxu0 %v4096_v42 }
 0x765   : > { %2372 = vadd.xlane.f32.xlu0 %v2367_v47 }
 0x767   : > { %3623 = vmatpush3.bf16.msra.mxu0 %v4097_v43 }
 0x768   : > { %3624 = vmatprep.subr.bf16.mxu0 %v4098_v39 }
 0x76b   : > { %3625 = vmatpush3.bf16.msra.mxu0 %v4099_v44 }
 0x7f0   : > { %v2371_v51 = vpop.xlane.xlu1 %2370 }
 0x7f1   : > { %v2375_v53 = vmul.f32 0.0078125, %v2371_v51 }
 0x7f2   : > { %v2373_v54 = vpop.xlane.xlu0 %2372 }
 0x7f3   : > { %v2377_v25 = vsub.f32 %v2366_v46, %v2375_v53  ;;  %v2376_v26 = vmul.f32 0.0078125, %v2373_v54  ;;  %v2431_v46 = vrot.slane %v2426_v45, %v1013_v35 }
 0x7f5   : > { %v2378_v55 = vsub.f32 %v2367_v47, %v2376_v26  ;;  %v2379_v56 = vmul.f32 %v2377_v25, %v2377_v25  ;;  %v2435_v47 = vrot.slane %v2426_v45, %v1017_v33 }
 0x7f7   : > { %2381 = vadd.xlane.f32.xlu0 %v2379_v56  ;;  %v2380_v57 = vmul.f32 %v2378_v55, %v2378_v55 }
 0x7f9   : > { %2383 = vadd.xlane.f32.xlu1 %v2380_v57 }
 0x884   : > { %v2382_v52 = vpop.xlane.xlu0 %2381 }
 0x885   : > { %v2385_v10 = vmul.f32 0.0078125, %v2382_v52 }
 0x886   : > { %v2384_v11 = vpop.xlane.xlu1 %2383 }
 0x887   : > { %v2387_v12 = vadd.f32 1e-12, %v2385_v10  ;;  %v2386_v60 = vmul.f32 0.0078125, %v2384_v11 }
 0x889   : > { %4132 = vrsqrt.f32 %v2387_v12  ;;  %v2388_v13 = vadd.f32 1e-12, %v2386_v60 }
 0x88b   : > { %4134 = vrsqrt.f32 %v2388_v13 }
 0x893   : > { %v4133_v14 = vpop.eup %4132 }
 0x894   : > { %v2391_v16 = vmul.f32 %v4133_v14, %v2377_v25 }
 0x895   : > { %v4135_v17 = vpop.eup %4134 }
 0x896   : > { %v2392_v5 = vmul.f32 %v4135_v17, %v2378_v55  ;;  %v2399_v18 = vmul.f32 %v3493_v15, %v2391_v16 }
 0x898   : > { %v2400_v20 = vmul.f32 %v3493_v15, %v2392_v5  ;;  %v5341_v19 = vadd.f32 %v3494_v6, %v2399_v18 }
 0x89a   : > { %v5343_v22 = vadd.f32 %v3494_v6, %v2400_v20 }
 0x89c   : > { %v2409_v24 = vpack.c.bf16 %v5343_v22, %v5341_v19 }
 0x89e   : > { %2551 = vmatmul.mubr.bf16.vlgmr.msra.gmra.mrb[44].mxu1 %v2409_v24 }
 0x971   : > { %v2552_v48 = vpop.f32.mrb[44].mxu1 }
 0x972   : > { %v2553_v4 = vadd.f32 %v2552_v48, %v2431_v46  ;;  %v2554_v49 = vpop.f32.mrb[45].mxu1 }
 0x973   : > { %v2555_v50 = vadd.f32 %v2554_v49, %v2435_v47  ;;  %v2556_v51 = vpop.f32.mrb[46].mxu1 }
 0x974   : > { %v2565_v53 = vmul.f32 0.044715, %v2553_v4  ;;  %v2557_v54 = vadd.f32 %v2556_v51, %v2431_v46  ;;  %v2558_v25 = vpop.f32.mrb[47].mxu1  ;;  %v2561_v15 = vmul.f32 0.5, %v2553_v4 }
 0x975   : > { %v2566_v26 = vmul.f32 0.044715, %v2555_v50  ;;  %v2559_v55 = vadd.f32 %v2558_v25, %v2435_v47  ;;  %v2562_v5 = vmul.f32 0.5, %v2555_v50 }
 0x976   : > { %v2569_v56 = vmul.f32 %v2565_v53, %v2553_v4  ;;  %v2567_v57 = vmul.f32 0.044715, %v2557_v54  ;;  %v2563_v16 = vmul.f32 0.5, %v2557_v54 }
 0x977   : > { %v2570_v58 = vmul.f32 %v2566_v26, %v2555_v50  ;;  %v2568_v59 = vmul.f32 0.044715, %v2559_v55  ;;  %v2564_v18 = vmul.f32 0.5, %v2559_v55 }
 0x978   : > { %v2573_v61 = vmul.f32 %v2569_v56, %v2553_v4  ;;  %v2571_v62 = vmul.f32 %v2567_v57, %v2557_v54 }
 0x979   : > { %v2574_v35 = vmul.f32 %v2570_v58, %v2555_v50  ;;  %v2572_v63 = vmul.f32 %v2568_v59, %v2559_v55  ;;  %v3529_v58 = vld [vmem:[%s956_s14] ss:$0 sm:$0xff] }
 0x97a   : > { %v2577_v32 = vadd.f32 %v2573_v61, %v2553_v4  ;;  %v2575_v33 = vmul.f32 %v2571_v62, %v2557_v54 }
 0x97b   : > { %v2576_v0 = vmul.f32 %v2572_v63, %v2559_v55  ;;  %v2578_v1 = vadd.f32 %v2574_v35, %v2555_v50 }
 0x97c   : > { %v2581_v2 = vmul.f32 0.7978846, %v2577_v32  ;;  %v2579_v3 = vadd.f32 %v2575_v33, %v2557_v54  ;;  %v4148_v32 = vld [vmem:[#allocation14] sm:$0xff] (!%p3530_p6)   ;;  %v4540_v33 = vmov (!%p3530_p6), 0.0  }
 0x97d   : > { %v2580_v7 = vadd.f32 %v2576_v0, %v2559_v55  ;;  %v2582_v8 = vmul.f32 0.7978846, %v2578_v1  ;;  %v3528_v55 = vld [vmem:[%s953_s6] ss:$0 sm:$0xff]  ;;  %3791 = vmatprep.subr.bf16.mxu0 (!%p3530_p6), %v4540_v33  ;;  %3811 = vmatprep.subr.bf16.mxu1 (!%p3530_p6), %v4540_v33  ;;  %v4150_v1 = vld [vmem:[#allocation14 + $0x10] sm:$0xff] (!%p3530_p6)  }
 0x97e   : > { %4136 = vtanh.f32 %v2581_v2  ;;  %v2583_v9 = vmul.f32 0.7978846, %v2579_v3  ;;  %v4149_v0 = vld [vmem:[#allocation14 + $0x8] sm:$0xff] (!%p3530_p6)   ;;  %3827 = vmatprep.mubr.msk.bf16.mxu1 (!%p3530_p6), %vm4541_vm6, %v4540_v33  ;;  %v4151_v3 = vld [vmem:[#allocation14 + $0x18] sm:$0xff] (!%p3530_p6)  }
 0x97f   : > { %v2584_v52 = vmul.f32 0.7978846, %v2580_v7  ;;  %4138 = vtanh.f32 %v2582_v8  ;;  %v4156_v2 = vld [vmem:[%s5608_s1] sm:$0xff] (!%p3530_p6)   ;;  %v4157_v7 = vld [vmem:[%s5609_s2 + $0x8] sm:$0xff] (!%p3530_p6)   ;;  %v4152_v8 = vld [vmem:[#allocation14 + $0x20] sm:$0xff] (!%p3530_p6)  }
 0x980   : > { %4140 = vtanh.f32 %v2583_v9  ;;  %3812 = vmatpush3.bf16.msra.mxu1 (!%p3530_p6), %v4156_v2  ;;  %v4158_v9 = vld [vmem:[%s5609_s2 + $0x10] sm:$0xff] (!%p3530_p6)  }
 0x981   : > { %4142 = vtanh.f32 %v2584_v52  ;;  %3813 = vmatprep.subr.bf16.mxu1 (!%p3530_p6), %v4540_v33 }
 0x984   : > { %3814 = vmatpush3.bf16.msra.mxu1 (!%p3530_p6), %v4157_v7 }
 0x985   : > { %3815 = vmatprep.subr.bf16.mxu1 (!%p3530_p6), %v4540_v33 }
 0x988   : > { %v4137_v10 = vpop.eup %4136  ;;  %3816 = vmatpush3.bf16.msra.mxu1 (!%p3530_p6), %v4158_v9 }
 0x989   : > { %v4139_v11 = vpop.eup %4138  ;;  %v2589_v12 = vadd.f32 1.0, %v4137_v10  ;;  %v4153_v10 = vld [vmem:[#allocation14 + $0x28] sm:$0xff] (!%p3530_p6)   ;;  %3817 = vmatprep.subr.bf16.mxu1 (!%p3530_p6), %v4540_v33 }
 0x98a   : > { %v4141_v60 = vpop.eup %4140  ;;  %v2590_v13 = vadd.f32 1.0, %v4139_v11 }
 0x98b   : > { %v4143_v14 = vpop.eup %4142  ;;  %v2591_v17 = vadd.f32 1.0, %v4141_v60  ;;  %v2593_v20 = vmul.f32 %v2589_v12, %v2561_v15  ;;  %v4159_v60 = vld [vmem:[%s5609_s2 + $0x18] sm:$0xff] (!%p3530_p6)  }
 0x98c   : > { %v2592_v6 = vadd.f32 1.0, %v4143_v14  ;;  %v2594_v27 = vmul.f32 %v2590_v13, %v2562_v5  ;;  %v4154_v13 = vld [vmem:[#allocation14 + $0x30] sm:$0xff] (!%p3530_p6)   ;;  %3818 = vmatpush3.bf16.msra.mxu1 (!%p3530_p6), %v4159_v60 }
 0x98d   : > { %v2595_v24 = vmul.f32 %v2591_v17, %v2563_v16  ;;  %3819 = vmatprep.subr.bf16.mxu1 (!%p3530_p6), %v4540_v33  ;;  %v4155_v16 = vld [vmem:[#allocation14 + $0x38] sm:$0xff] (!%p3530_p6)  }
 0x98e   : > { %v2596_v28 = vmul.f32 %v2592_v6, %v2564_v18  ;;  %v4160_v18 = vld [vmem:[%s5609_s2 + $0x20] sm:$0xff] (!%p3530_p6)   ;;  %v4161_v6 = vld [vmem:[%s5609_s2 + $0x28] sm:$0xff] (!%p3530_p6)  }
 0x98f   : > { %v2597_v29 = vpack.c.bf16 %v2595_v24, %v2593_v20  ;;  %v4162_v20 = vld [vmem:[%s5609_s2 + $0x30] sm:$0xff] (!%p3530_p6)   ;;  %v4163_v24 = vld [vmem:[%s5609_s2 + $0x38] sm:$0xff] (!%p3530_p6)  }
 0x990   : > { %v2598_v30 = vpack.c.bf16 %v2596_v28, %v2594_v27  ;;  %3820 = vmatpush3.bf16.msra.mxu1 (!%p3530_p6), %v4160_v18  ;;  %v4164_v27 = vld [vmem:[%s5610_s16] sm:$0xff] (!%p3530_p6)   ;;  %v4165_v28 = vld [vmem:[%s5610_s16 + $0x8] sm:$0xff] (!%p3530_p6)  }
 0x991   : > { %3821 = vmatprep.subr.bf16.mxu1 (!%p3530_p6), %v4540_v33 }
 0x992   : > { %2766 = vmatprep.mubr.bf16.mxu0 %v2598_v30 }
 0x993   : > { %2767 = vmatmul.mubr.bf16.vlgmr.msra.gmra.mrb[32].mxu0 %v2597_v29  ;;  %v3531_v29 = vld [vmem:[%s5611_s27] ss:$0 sm:$0xff] (!%p3530_p6) }
 0x994   : > { %3792 = vmatpush3.bf16.msra.mxu0 (!%p3530_p6), %v4148_v32  ;;  %3807 = vmatprep.mubr.msk.bf16.mxu0 (!%p3530_p6), %vm4541_vm6, %v4540_v33 }
 0x995   : > { %3793 = vmatprep.subr.bf16.mxu0 (!%p3530_p6), %v4540_v33  ;;  %3822 = vmatpush3.bf16.msra.mxu1 (!%p3530_p6), %v4161_v6 }
 0x996   : > { %3823 = vmatprep.subr.bf16.mxu1 (!%p3530_p6), %v4540_v33 }
 0x998   : > { %3794 = vmatpush3.bf16.msra.mxu0 (!%p3530_p6), %v4149_v0 }
 0x999   : > { %3795 = vmatprep.subr.bf16.mxu0 (!%p3530_p6), %v4540_v33  ;;  %3824 = vmatpush3.bf16.msra.mxu1 (!%p3530_p6), %v4162_v20 }
 0x99a   : > { %3825 = vmatprep.subr.bf16.mxu1 (!%p3530_p6), %v4540_v33 }
 0x99c   : > { %3796 = vmatpush3.bf16.msra.mxu0 (!%p3530_p6), %v4150_v1 }
 0x99d   : > { %3797 = vmatprep.subr.bf16.mxu0 (!%p3530_p6), %v4540_v33  ;;  %3826 = vmatpush3.bf16.msra.mxu1 (!%p3530_p6), %v4163_v24 }
 0x9a0   : > { %3798 = vmatpush3.bf16.msra.mxu0 (!%p3530_p6), %v4151_v3 }
 0x9a1   : > { %3799 = vmatprep.subr.bf16.mxu0 (!%p3530_p6), %v4540_v33 }
 0x9a4   : > { %3800 = vmatpush3.bf16.msra.mxu0 (!%p3530_p6), %v4152_v8 }
 0x9a5   : > { %3801 = vmatprep.subr.bf16.mxu0 (!%p3530_p6), %v4540_v33 }
 0x9a8   : > { %3802 = vmatpush3.bf16.msra.mxu0 (!%p3530_p6), %v4153_v10 }
 0x9a9   : > { %3803 = vmatprep.subr.bf16.mxu0 (!%p3530_p6), %v4540_v33 }
 0x9ac   : > { %3804 = vmatpush3.bf16.msra.mxu0 (!%p3530_p6), %v4154_v13 }
 0x9ad   : > { %3805 = vmatprep.subr.bf16.mxu0 (!%p3530_p6), %v4540_v33 }
 0x9b0   : > { %3806 = vmatpush3.bf16.msra.mxu0 (!%p3530_p6), %v4155_v16 }
 0x9b1   : > { %3831 = vmatprep.subr.bf16.mxu0 (!%p3530_p6), %v4540_v33 }
 0xa66   : > { %v3626_v34 = vpop.f32.mrb[32].mxu0 }
 0xa67   : > { %v3627_v37 = vpop.f32.mrb[33].mxu0 }
 0xa68   : > { %v3628_v23 = vadd.f32 %v3627_v37, %v3626_v34  ;;  %v3629_v38 = vpop.f32.mrb[34].mxu0 }
 0xa69   : > { %v3630_v41 = vpop.f32.mrb[35].mxu0 }
 0xa6a   : > { %v2769_v21 = vadd.f32 %v3628_v23, %v3511_v36  ;;  %v3631_v40 = vadd.f32 %v3630_v41, %v3629_v38 }
 0xa6c   : > { %v2772_v42 = vadd.f32 %v3631_v40, %v3511_v36  ;;  %v2775_v43 = vadd.f32 %v2769_v21, %v5341_v19  ;;  %v4166_v21 = vld [vmem:[%s5610_s16 + $0x10] sm:$0xff] (!%p3530_p6)   ;;  %v4167_v40 = vld [vmem:[%s5610_s16 + $0x18] sm:$0xff] (!%p3530_p6)  }
 0xa6e   : > { %2779 = vadd.xlane.f32.xlu0 %v2775_v43  ;;  %v2776_v39 = vadd.f32 %v2772_v42, %v5343_v22  ;;  %v3540_v42 = vld [vmem:[%s5612_s18] ss:$0 sm:$0xff] (!%p3530_p6) }
 0xa70   : > { %2781 = vadd.xlane.f32.xlu1 %v2776_v39 }
 0xafb   : > { %v2780_v44 = vpop.xlane.xlu0 %2779 }
 0xafc   : > { %v2783_v45 = vmul.f32 0.0078125, %v2780_v44 }
 0xafd   : > { %v2782_v46 = vpop.xlane.xlu1 %2781 }
 0xafe   : > { %v2785_v47 = vsub.f32 %v2775_v43, %v2783_v45  ;;  %v2784_v48 = vmul.f32 0.0078125, %v2782_v46 }
 0xb00   : > { %v2786_v4 = vsub.f32 %v2776_v39, %v2784_v48  ;;  %v2787_v49 = vmul.f32 %v2785_v47, %v2785_v47 }
 0xb02   : > { %2789 = vadd.xlane.f32.xlu0 %v2787_v49  ;;  %v2788_v50 = vmul.f32 %v2786_v4, %v2786_v4 }
 0xb04   : > { %2791 = vadd.xlane.f32.xlu1 %v2788_v50 }
 0xb8f   : > { %v2790_v51 = vpop.xlane.xlu0 %2789 }
 0xb90   : > { %v2793_v53 = vmul.f32 0.0078125, %v2790_v51 }
 0xb91   : > { %v2792_v54 = vpop.xlane.xlu1 %2791 }
 0xb92   : > { %v2795_v19 = vadd.f32 1e-12, %v2793_v53  ;;  %v2794_v25 = vmul.f32 0.0078125, %v2792_v54 }
 0xb94   : > { %4144 = vrsqrt.f32 %v2795_v19  ;;  %v2796_v22 = vadd.f32 1e-12, %v2794_v25 }
 0xb96   : > { %4146 = vrsqrt.f32 %v2796_v22 }
 0xb9e   : > { %v4145_v26 = vpop.eup %4144 }
 0xb9f   : > { %v2799_v56 = vmul.f32 %v4145_v26, %v2785_v47 }
 0xba0   : > { %v4147_v57 = vpop.eup %4146 }
 0xba1   : > { %v2807_v59 = vmul.f32 %v3528_v55, %v2799_v56  ;;  %v2800_v61 = vmul.f32 %v4147_v57, %v2786_v4  ;;  %2822 = sbr.rel (%p3530_p6) target bundleno = 4410 (0x113a), region = 148  ;;  %v3549_v4 = vld [vmem:[%s5613_s25] ss:$0 sm:$0xff] (!%p3530_p6) }
 0xba3   : > { %v2815_v62 = vadd.f32 %v3529_v58, %v2807_v59  ;;  %v2808_v35 = vmul.f32 %v3528_v55, %v2800_v61 }
 0xba5   : > { %2817 = vst [vmem:[#allocation2] sm:$0xff] %v2815_v62  ;;  %v2816_v63 = vadd.f32 %v3529_v58, %v2808_v35  ;;  %v2823_v11 = vpack.c.bf16 (!%p3530_p6), %v2815_v62, %v2815_v62 }
 0xba7   : > { %2818 = vst [vmem:[#allocation2 + $0x8] sm:$0xff] %v2816_v63  ;;  %v2824_v52 = vpack.c.bf16 (!%p3530_p6), %v2816_v63, %v2816_v63  ;;  %v2850_v14 = vunpack.c.l.b16 (!%p3530_p6), %v2823_v11  ;;  %v3157_v63 = vand.u32 (!%p3530_p6), 127, %v1011_v31 }
 0xba9   : > { %v2851_v12 = vunpack.c.l.b16 %v2824_v52 }
 0xbab   : > { %v2852_v15 = vrot.slane %v2851_v12, 7 }
 0xbad   : > { %v2854_v17 = vsel %vm2853_vm7, %v2852_v15, %v2850_v14 }
 0xbae   : > { %v2855_v5 = vpack.c.b16 %v2854_v17, %v2854_v17 }
 0xbb0   : > { %3808 = vmatmul.mubr.bf16.vlgmr.msra.gmra.mrb[0].mxu0 %v2855_v5 }
 0xbb1   : > { %3839 = vmatprep.mubr.msk.bf16.mxu0 %vm4541_vm6, %v4540_v33  ;;  %3832 = vmatpush3.bf16.msra.mxu0 %v4164_v27 }
 0xbb2   : > { %3833 = vmatprep.subr.bf16.mxu0 %v4540_v33 }
 0xbb5   : > { %3834 = vmatpush3.bf16.msra.mxu0 %v4165_v28 }
 0xbb6   : > { %3835 = vmatprep.subr.bf16.mxu0 %v4540_v33 }
 0xbb9   : > { %3836 = vmatpush3.bf16.msra.mxu0 %v4166_v21 }
 0xbba   : > { %3837 = vmatprep.subr.bf16.mxu0 %v4540_v33 }
 0xbbd   : > { %3838 = vmatpush3.bf16.msra.mxu0 %v4167_v40 }
 0xc83   : > { %v2939_v30 = vpop.f32.mrb[0].mxu0 }
 0xc84   : > { %v2940_v34 = vadd.f32 %v3531_v29, %v2939_v30  ;;  %v3809_v36 = vpop.f32.mrb[1].mxu0 }
 0xc85   : > { %v2942_v37 = vpop.f32.mrb[2].mxu0 }
 0xc86   : > { %4168 = vtanh.f32 %v2940_v34  ;;  %v3810_v23 = vpop.f32.mrb[3].mxu0 }
 0xc90   : > { %v4169_v38 = vpop.eup %4168 }
 0xc91   : > { %v2946_v41 = vpack.c.bf16 %v4169_v38, %v4169_v38 }
 0xc93   : > { %3828 = vmatmul.mubr.bf16.vlgmr.msra.gmra.mrb[0].mxu1 %v2946_v41 }
 0xd66   : > { %v3052_v43 = vpop.f32.mrb[0].mxu1 }
 0xd67   : > { %v3053_v39 = vadd.f32 %v3540_v42, %v3052_v43  ;;  %v3829_v44 = vpop.f32.mrb[1].mxu1 }
 0xd68   : > { %v3055_v45 = vpop.f32.mrb[2].mxu1 }
 0xd69   : > { %v3058_v46 = vmax.f32 %v3053_v39, 0.0  ;;  %v3830_v47 = vpop.f32.mrb[3].mxu1 }
 0xd6b   : > { %v3059_v48 = vpack.c.bf16 %v3058_v46, %v3058_v46 }
 0xd6d   : > { %3840 = vmatmul.mubr.msk.bf16.vlgmr.msra.gmra.mrb[4].mxu0 %vm2247_vm4, %v3059_v48 }
 0xe40   : > { %v3136_v49 = vpop.f32.mrb[4].mxu0 }
 0xe41   : > { %v3137_v50 = vadd.f32 %v3549_v4, %v3136_v49  ;;  %v3841_v51 = vpop.f32.mrb[5].mxu0 }
 0xe42   : > { %v3139_v53 = vpop.f32.mrb[6].mxu0 }
 0xe43   : > { %v3842_v54 = vpop.f32.mrb[7].mxu0  ;;  %v3143_v19 = vsel %vm3142_vm8, %v3137_v50, -inf }
 0xe44   : > { %3144 = vmax.xlane.f32.xlu0 %v3143_v19 }
 0xed1   : > { %v3145_v25 = vpop.xlane.xlu0 %3144 }
 0xed2   : > { %v3146_v22 = vsub.f32 %v3137_v50, %v3145_v25 }
 0xed4   : > { %v3147_v26 = vmul.f32 1.442695, %v3146_v22 }
 0xed6   : > { %4170 = vpow2.f32 %v3147_v26 }
 0xee0   : > { %v4171_v55 = vpop.eup %4170 }
 0xee1   : > { %v3149_v56 = vsel %vm3142_vm8, %v4171_v55, 0.0 }
 0xee2   : > { %3150 = vadd.xlane.f32.xlu0 %v3149_v56 }
 0xf6f   : > { %v3151_v57 = vpop.xlane.xlu0 %3150 }
 0xf70   : > { %4172 = vlog2.f32 %v3151_v57 }
 0xf7a   : > { %v4173_v58 = vpop.eup %4172 }
 0xf7b   : > { %v3153_v59 = vmul.f32 0.6931472, %v4173_v58 }
 0xf7d   : > { %v3154_v61 = vadd.f32 %v3153_v59, %v3145_v25 }
 0xf7f   : > { %v3155_v62 = vsub.f32 %v3137_v50, %v3154_v61 }
 0xf81   : > { %v3158_v35 = vsel %vm3142_vm8, %v3155_v62, -inf }
 0xf82   : > { %3159 = vmax.xlane.f32.xlu1 %v3158_v35 }
0x100f   : > { %v3160_v32 = vpop.xlane.xlu1 %3159 }
0x1010   : > { %vm3161_vm9 = vcmp.eq.f32.partialorder %v3155_v62, %v3160_v32 }
0x1011   : > { %v3162_v33 = vsel %vm3161_vm9, %v3157_v63, 6 }
0x1012   : > { %v3163_v0 = vsel %vm3142_vm8, %v3162_v33, 2147483647 }
0x1013   : > { %v3165_v1 = vshra.s32 %v3163_v0, 16  ;;  %v3164_v3 = vand.u32 65535, %v3163_v0 }
0x1015   : > { %v3167_v2 = vcvt.s32.f32 %v3165_v1  ;;  %v3166_v8 = vcvt.s32.f32 %v3164_v3 }
0x1017   : > { %3168 = vmin.xlane.f32.xlu1 %v3167_v2 }
0x10a4   : > { %v3169_v7 = vpop.xlane.xlu1 %3168 }
0x10a5   : > { %vm3170_vm10 = vcmp.eq.f32.partialorder %v3167_v2, %v3169_v7  ;;  %v3175_v52 = vcvt.f32.s32 %v3169_v7 }
0x10a6   : > { %v3171_v9 = vsel %vm3170_vm10, %v3166_v8, inf }
0x10a7   : > { %3172 = vmin.xlane.f32.xlu0 %v3171_v9  ;;  %v3176_v11 = vshll.u32 %v3175_v52, 16 }
0x1134   : > { %v3173_v10 = vpop.xlane.xlu0 %3172 }
0x1135   : > { %v3174_v12 = vcvt.f32.s32 %v3173_v10 }
0x1137   : > { %v3177_v31 = vadd.s32 %v3176_v11, %v3174_v12 }
0x1139   : > { %3179 = vst.msk [vmem:[%s5614_s30] sm:$0x3] %vm3178_vm11, %v3177_v31 }
0x113a PF: > { %s5615_s24 = sld [smem:[#allocation22_spill]]  ;;  %s5616_s1 = sld [smem:[#allocation19_spill]] }
0x113b   : > { %s5617_s22 = sld [smem:[#allocation20_spill]]  ;;  %s5618_s23 = sld [smem:[#allocation23_spill]] }
0x1140   : > { %p29_p0 = scmp.ge.s32.totalorder %s5615_s24, 4  }
0x1142   :  { %31 = sbr.rel (!%p29_p0) target bundleno = 25 (0x19), region = 236 }
0x1149   :  { %3191 = vsyncpa [#allocation4], 1 }
0x114a   :  { %3193 = vsyncpa [#allocation4 + $0x1], 1 }
0x114b   :  { %3194 = vsyncpa [#allocation6], 1 }

</bundles_post_ra>
